<compile_context>
chip_gen: v7x
topology: tpu7x:2x2x1
jax: 0.10.0
libtpu: 0.0.40
codegen_flags: <defaults>
</compile_context>

<pallas_src>
import math

import jax
import jax.numpy as jnp
from jax import lax
from jax.experimental import pallas as pl
from jax.experimental.pallas import tpu as pltpu


def _round_up(n, m):
    return ((n + m - 1) // m) * m


def _gelu_erf(v):
    # Exact erf GELU == torch.nn.GELU() default.
    return 0.5 * v * (1.0 + lax.erf(v * 0.7071067811865476))


def _gelu_tanh(v):
    # tanh approximation (EUP-friendly); enable with approx_gelu=True if bit-parity
    # with torch's exact GELU is not required.
    return 0.5 * v * (1.0 + jnp.tanh(0.7978845608028654 * (v + 0.044715 * v * v * v)))


def _make_kernel(approx_gelu: bool):
    act = _gelu_tanh if approx_gelu else _gelu_erf

    def kernel(xa_ref, xb_ref, scale_ref, shift_ref, wh_ref, ww_ref,
               bh_ref, bw_ref, wf1_ref, wf2_ref, wf3_ref, om_ref, ow_ref):
        # xa_ref: (1, Hp, Wp, Cp) NHWC block          xb_ref: (1, Wp, Hp, Cp) spatially transposed
        # scale/shift: (1, 1, Cp) folded eval-BN       wh/ww: (Wp,Wp)/(Hp,Hp) bf16 [out, in]
        # bh/bw: (Wp,Cp)/(Hp,Cp) f32 bias (broadcast over channels)
        # wf1/wf2/wf3: (Cp, Cp) bf16, pre-transposed so that act @ wfk contracts input channels
        _, Hp, Wp, Cp = xa_ref.shape

        scale = scale_ref[...]                      # (1, 1, Cp)
        shift = shift_ref[...]

        # BatchNorm (eval affine) + GELU in f32 on the VPU.
        ta = act(xa_ref[0] * scale + shift)         # (Hp, Wp, Cp)
        tb = act(xb_ref[0] * scale + shift)         # (Wp, Hp, Cp)  same values, transposed layout
        ta_bf = ta.astype(jnp.bfloat16)
        tb_bf = tb.astype(jnp.bfloat16)

        # --- branch mixing along W:  xh[h, v, c] = sum_w Wh[v, w] * t[h, w, c] + bh[v]
        wh_b = jnp.broadcast_to(wh_ref[...], (Hp, Wp, Wp))
        xh = lax.dot_general(
            wh_b, ta_bf,
            dimension_numbers=(((2,), (1,)), ((0,), (0,))),
            preferred_element_type=jnp.float32,
        ) + bh_ref[...]                             # (Hp, Wp, Cp), bias added in f32

        # --- branch mixing along H (computed in the transposed layout):
        #     xw_t[w, u, c] = sum_h Ww[u, h] * t[h, w, c] + bw[u]
        ww_b = jnp.broadcast_to(ww_ref[...], (Wp, Hp, Hp))
        xw_t = lax.dot_general(
            ww_b, tb_bf,
            dimension_numbers=(((2,), (1,)), ((0,), (0,))),
            preferred_element_type=jnp.float32,
        ) + bw_ref[...]                             # (Wp, Hp, Cp)

        # --- fuse: 1x1 conv over 3C channels, split into three C-contractions.
        # Rows = pixels (Hp*Wp of them), lanes = output channels -> lane-dense MXU work.
        t_f = ta_bf.reshape(Hp * Wp, Cp)
        xh_f = xh.astype(jnp.bfloat16).reshape(Hp * Wp, Cp)
        main = (jnp.dot(t_f, wf1_ref[...], preferred_element_type=jnp.float32)
                + jnp.dot(xh_f, wf2_ref[...], preferred_element_type=jnp.float32))
        om_ref[0] = main.reshape(Hp, Wp, Cp)

        xw_f = xw_t.astype(jnp.bfloat16).reshape(Wp * Hp, Cp)
        ow_ref[0] = jnp.dot(
            xw_f, wf3_ref[...], preferred_element_type=jnp.float32
        ).reshape(Wp, Hp, Cp)

    return kernel


def smlp_block(x, params, *, eps=1e-5, approx_gelu=False):
    """sMLPBlock forward. x: (B, C, H, W) float32 NCHW. Returns (B, C, H, W) float32.

    params = (gamma, beta, running_mean, running_var,   # BatchNorm2d (eval mode)
              wh, bh,                                   # proj_h weight (H,H) [out,in] + bias (H,)
              ww, bw,                                   # proh_w weight (W,W) [out,in] + bias (W,)
              wf)                                       # fuse weight (C, 3C), no bias
    """
    gamma, beta, mean, var, wh, bh, ww, bw, wf = params
    B, C, H, W = x.shape
    assert H == W, "sMLPBlock requires square spatial dims"
    assert wh.shape == (W, W) and ww.shape == (H, H) and wf.shape == (C, 3 * C)
    # TODO(synk): training-mode BatchNorm (batch statistics + running-stat update) is not
    # implemented; the kernel folds eval-mode BN into a per-channel affine.

    f32, bf16 = jnp.float32, jnp.bfloat16
    scale = (gamma / jnp.sqrt(var + eps)).astype(f32)
    shift = (beta - mean * scale).astype(f32)

    # Lane-dense / sublane-aligned padding.
    Cp = _round_up(C, 128)
    Hp = _round_up(H, 8)
    Wp = _round_up(W, 8)

    xf = x.astype(f32)
    x_hwc = jnp.pad(jnp.transpose(xf, (0, 2, 3, 1)),
                    ((0, 0), (0, Hp - H), (0, Wp - W), (0, Cp - C)))       # (B, Hp, Wp, Cp)
    x_whc = jnp.pad(jnp.transpose(xf, (0, 3, 2, 1)),
                    ((0, 0), (0, Wp - W), (0, Hp - H), (0, Cp - C)))       # (B, Wp, Hp, Cp)

    scale_p = jnp.pad(scale, (0, Cp - C)).reshape(1, 1, Cp)
    shift_p = jnp.pad(shift, (0, Cp - C)).reshape(1, 1, Cp)

    # Weights stored bf16 in HBM (MXU operands); zero padding keeps padded rows/cols inert.
    wh_p = jnp.pad(wh.astype(f32), ((0, Wp - W), (0, Wp - W))).astype(bf16)
    ww_p = jnp.pad(ww.astype(f32), ((0, Hp - H), (0, Hp - H))).astype(bf16)
    wf1_t = jnp.pad(wf[:, :C].T.astype(f32), ((0, Cp - C), (0, Cp - C))).astype(bf16)
    wf2_t = jnp.pad(wf[:, C:2 * C].T.astype(f32), ((0, Cp - C), (0, Cp - C))).astype(bf16)
    wf3_t = jnp.pad(wf[:, 2 * C:].T.astype(f32), ((0, Cp - C), (0, Cp - C))).astype(bf16)

    # Biases broadcast over channels (added in f32 inside the kernel).
    bh_mat = jnp.broadcast_to(jnp.pad(bh.astype(f32), (0, Wp - W))[:, None], (Wp, Cp))
    bw_mat = jnp.broadcast_to(jnp.pad(bw.astype(f32), (0, Hp - H))[:, None], (Hp, Cp))

    kernel = _make_kernel(approx_gelu)

    grid_spec = pltpu.PrefetchScalarGridSpec(
        num_scalar_prefetch=0,
        grid=(B,),
        in_specs=[
            pl.BlockSpec((1, Hp, Wp, Cp), lambda b: (b, 0, 0, 0)),   # x (NHWC)
            pl.BlockSpec((1, Wp, Hp, Cp), lambda b: (b, 0, 0, 0)),   # x (spatially transposed)
            pl.BlockSpec((1, 1, Cp), lambda b: (0, 0, 0)),           # BN scale
            pl.BlockSpec((1, 1, Cp), lambda b: (0, 0, 0)),           # BN shift
            pl.BlockSpec((Wp, Wp), lambda b: (0, 0)),                # Wh
            pl.BlockSpec((Hp, Hp), lambda b: (0, 0)),                # Ww
            pl.BlockSpec((Wp, Cp), lambda b: (0, 0)),                # bh (channel-broadcast)
            pl.BlockSpec((Hp, Cp), lambda b: (0, 0)),                # bw (channel-broadcast)
            pl.BlockSpec((Cp, Cp), lambda b: (0, 0)),                # Wf1^T
            pl.BlockSpec((Cp, Cp), lambda b: (0, 0)),                # Wf2^T
            pl.BlockSpec((Cp, Cp), lambda b: (0, 0)),                # Wf3^T
        ],
        out_specs=[
            pl.BlockSpec((1, Hp, Wp, Cp), lambda b: (b, 0, 0, 0)),   # fuse(t) + fuse(x_h)
            pl.BlockSpec((1, Wp, Hp, Cp), lambda b: (b, 0, 0, 0)),   # fuse(x_w), spatially transposed
        ],
    )

    out_main, out_wT = pl.pallas_call(
        kernel,
        out_shape=(jax.ShapeDtypeStruct((B, Hp, Wp, Cp), jnp.float32),
                   jax.ShapeDtypeStruct((B, Wp, Hp, Cp), jnp.float32)),
        grid_spec=grid_spec,
        compiler_params=pltpu.CompilerParams(
            dimension_semantics=("parallel",),
            vmem_limit_bytes=64 * 1024 * 1024,
        ),
    )(x_hwc, x_whc, scale_p, shift_p, wh_p, ww_p, bh_mat, bw_mat, wf1_t, wf2_t, wf3_t)

    # Combine the two fuse partials (cheap XLA transpose+add), drop padding, back to NCHW.
    out_nhwc = (out_main + jnp.transpose(out_wT, (0, 2, 1, 3)))[:, :H, :W, :C]
    return jnp.transpose(out_nhwc, (0, 3, 1, 2))


def smlp_reference(x, params, *, eps=1e-5, approx_gelu=False):
    """Plain-JAX reference for sMLPBlock.forward (eval-mode BN). Matmul operands are cast
    to bf16 with f32 accumulation to mirror the kernel's MXU precision."""
    gamma, beta, mean, var, wh, bh, ww, bw, wf = params
    B, C, H, W = x.shape
    scale = gamma / jnp.sqrt(var + eps)
    shift = beta - mean * scale
    act = _gelu_tanh if approx_gelu else _gelu_erf
    t = act(x * scale[None, :, None, None] + shift[None, :, None, None])
    bf = jnp.bfloat16
    t_bf = t.astype(bf)
    # proj_h on x.permute(0,3,1,2): mixes the W axis.
    x_h = jnp.einsum('vw,bchw->bchv', wh.astype(bf), t_bf,
                     preferred_element_type=jnp.float32) + bh[None, None, None, :]
    # proh_w on x.permute(0,2,1,3): mixes the H axis.
    x_w = jnp.einsum('uh,bchw->bcuw', ww.astype(bf), t_bf,
                     preferred_element_type=jnp.float32) + bw[None, None, :, None]
    # fuse 1x1 conv on concat([t, x_h, x_w], channel), no bias.
    wf1, wf2, wf3 = wf[:, :C], wf[:, C:2 * C], wf[:, 2 * C:]
    out = (jnp.einsum('oc,bchw->bohw', wf1.astype(bf), t_bf,
                      preferred_element_type=jnp.float32)
           + jnp.einsum('oc,bchw->bohw', wf2.astype(bf), x_h.astype(bf),
                        preferred_element_type=jnp.float32)
           + jnp.einsum('oc,bchw->bohw', wf3.astype(bf), x_w.astype(bf),
                        preferred_element_type=jnp.float32))
    return out


def _init_params(key, C, H, W):
    """Deterministic synthetic parameters mimicking the torch module's init."""
    ks = jax.random.split(key, 9)
    f32 = jnp.float32
    gamma = 1.0 + 0.1 * jax.random.normal(ks[0], (C,), f32)
    beta = 0.1 * jax.random.normal(ks[1], (C,), f32)
    mean = 0.1 * jax.random.normal(ks[2], (C,), f32)
    var = 1.0 + 0.1 * jax.random.uniform(ks[3], (C,), f32)
    kh = 1.0 / math.sqrt(H)
    wh = jax.random.uniform(ks[4], (W, W), f32, -kh, kh)     # proj_h.weight[:, :, 0, 0]
    bh = jax.random.uniform(ks[5], (W,), f32, -kh, kh)
    kw = 1.0 / math.sqrt(W)
    ww = jax.random.uniform(ks[6], (H, H), f32, -kw, kw)     # proh_w.weight[:, :, 0, 0]
    bw = jax.random.uniform(ks[7], (H,), f32, -kw, kw)
    kf = 1.0 / math.sqrt(3 * C)
    wf = jax.random.uniform(ks[8], (C, 3 * C), f32, -kf, kf)  # fuse.weight[:, :, 0, 0]
    return (gamma, beta, mean, var, wh, bh, ww, bw, wf)


if __name__ == "__main__":
    B, C, H, W = 2, 32, 16, 16
    key = jax.random.PRNGKey(0)
    kx, kp = jax.random.split(key)
    x = jax.random.normal(kx, (B, C, H, W), jnp.float32)
    params = _init_params(kp, C, H, W)

    fwd = jax.jit(smlp_block)
    out = jax.block_until_ready(fwd(x, params))

    ref = smlp_reference(x, params)
    assert out.shape == ref.shape, (out.shape, ref.shape)
    # Tolerance reflects bf16 MXU operands (f32 accumulation) and accumulation-order
    # differences between the Pallas kernel and the XLA reference.
    assert jnp.allclose(out, ref, atol=1e-2, rtol=1e-2), (
        "mismatch vs reference, max abs err = "
        + str(float(jnp.max(jnp.abs(out - ref)))))
    print("KERNEL_OK")
</pallas_src>

<mosaic_0001>
module attributes {stable_mosaic.version = 11 : i64} {
  func.func @kernel(%arg0: i32, %arg1: memref<1x16x16x128xf32, #tpu.memory_space<vmem>>, %arg2: memref<1x16x16x128xf32, #tpu.memory_space<vmem>>, %arg3: memref<1x1x128xf32, #tpu.memory_space<vmem>>, %arg4: memref<1x1x128xf32, #tpu.memory_space<vmem>>, %arg5: memref<16x16xbf16, #tpu.memory_space<vmem>>, %arg6: memref<16x16xbf16, #tpu.memory_space<vmem>>, %arg7: memref<16x128xf32, #tpu.memory_space<vmem>>, %arg8: memref<16x128xf32, #tpu.memory_space<vmem>>, %arg9: memref<128x128xbf16, #tpu.memory_space<vmem>>, %arg10: memref<128x128xbf16, #tpu.memory_space<vmem>>, %arg11: memref<128x128xbf16, #tpu.memory_space<vmem>>, %arg12: memref<1x16x16x128xf32, #tpu.memory_space<vmem>>, %arg13: memref<1x16x16x128xf32, #tpu.memory_space<vmem>>) attributes {dimension_semantics = [#tpu.dimension_semantics<parallel>], iteration_bounds = array<i64: 2>, scalar_prefetch = 0 : i64, scratch_operands = 0 : i64, tpu.core_type = #tpu.core_type<tc>, window_params = [{transform_indices = @transform_0, window_bounds = array<i64: 1, 16, 16, 128>}, {transform_indices = @transform_1, window_bounds = array<i64: 1, 16, 16, 128>}, {pipeline_mode = #tpu.pipeline_mode<synchronous>, transform_indices = @transform_2, window_bounds = array<i64: 1, 1, 128>}, {pipeline_mode = #tpu.pipeline_mode<synchronous>, transform_indices = @transform_3, window_bounds = array<i64: 1, 1, 128>}, {pipeline_mode = #tpu.pipeline_mode<synchronous>, transform_indices = @transform_4, window_bounds = array<i64: 16, 16>}, {pipeline_mode = #tpu.pipeline_mode<synchronous>, transform_indices = @transform_5, window_bounds = array<i64: 16, 16>}, {pipeline_mode = #tpu.pipeline_mode<synchronous>, transform_indices = @transform_6, window_bounds = array<i64: 16, 128>}, {pipeline_mode = #tpu.pipeline_mode<synchronous>, transform_indices = @transform_7, window_bounds = array<i64: 16, 128>}, {pipeline_mode = #tpu.pipeline_mode<synchronous>, transform_indices = @transform_8, window_bounds = array<i64: 128, 128>}, {pipeline_mode = #tpu.pipeline_mode<synchronous>, transform_indices = @transform_9, window_bounds = array<i64: 128, 128>}, {pipeline_mode = #tpu.pipeline_mode<synchronous>, transform_indices = @transform_10, window_bounds = array<i64: 128, 128>}, {transform_indices = @transform_11, window_bounds = array<i64: 1, 16, 16, 128>}, {transform_indices = @transform_12, window_bounds = array<i64: 1, 16, 16, 128>}]} {
    %c0 = arith.constant 0 : index
    %c0_0 = arith.constant 0 : index
    %c0_1 = arith.constant 0 : index
    %0 = vector.load %arg3[%c0, %c0_0, %c0_1] : memref<1x1x128xf32, #tpu.memory_space<vmem>>, vector<1x1x128xf32>
    %c0_2 = arith.constant 0 : index
    %c0_3 = arith.constant 0 : index
    %c0_4 = arith.constant 0 : index
    %1 = vector.load %arg4[%c0_2, %c0_3, %c0_4] : memref<1x1x128xf32, #tpu.memory_space<vmem>>, vector<1x1x128xf32>
    %c0_5 = arith.constant 0 : index
    %c0_6 = arith.constant 0 : index
    %c0_7 = arith.constant 0 : index
    %c0_8 = arith.constant 0 : index
    %2 = vector.load %arg1[%c0_5, %c0_6, %c0_7, %c0_8] : memref<1x16x16x128xf32, #tpu.memory_space<vmem>>, vector<1x16x16x128xf32>
    %3 = vector.shape_cast %2 : vector<1x16x16x128xf32> to vector<16x16x128xf32>
    %4 = vector.broadcast %0 : vector<1x1x128xf32> to vector<16x16x128xf32>
    %5 = arith.mulf %3, %4 : vector<16x16x128xf32>
    %6 = vector.broadcast %1 : vector<1x1x128xf32> to vector<16x16x128xf32>
    %7 = arith.addf %5, %6 : vector<16x16x128xf32>
    %cst = arith.constant 5.000000e-01 : f32
    %8 = vector.broadcast %cst : f32 to vector<16x16x128xf32>
    %9 = arith.mulf %8, %7 : vector<16x16x128xf32>
    %cst_9 = arith.constant 0.707106769 : f32
    %10 = vector.broadcast %cst_9 : f32 to vector<16x16x128xf32>
    %11 = arith.mulf %7, %10 : vector<16x16x128xf32>
    %12 = math.erf %11 : vector<16x16x128xf32>
    %cst_10 = arith.constant 1.000000e+00 : f32
    %13 = vector.broadcast %cst_10 : f32 to vector<16x16x128xf32>
    %14 = arith.addf %13, %12 : vector<16x16x128xf32>
    %15 = arith.mulf %9, %14 : vector<16x16x128xf32>
    %c0_11 = arith.constant 0 : index
    %c0_12 = arith.constant 0 : index
    %c0_13 = arith.constant 0 : index
    %c0_14 = arith.constant 0 : index
    %16 = vector.load %arg2[%c0_11, %c0_12, %c0_13, %c0_14] : memref<1x16x16x128xf32, #tpu.memory_space<vmem>>, vector<1x16x16x128xf32>
    %17 = vector.shape_cast %16 : vector<1x16x16x128xf32> to vector<16x16x128xf32>
    %18 = vector.broadcast %0 : vector<1x1x128xf32> to vector<16x16x128xf32>
    %19 = arith.mulf %17, %18 : vector<16x16x128xf32>
    %20 = vector.broadcast %1 : vector<1x1x128xf32> to vector<16x16x128xf32>
    %21 = arith.addf %19, %20 : vector<16x16x128xf32>
    %cst_15 = arith.constant 5.000000e-01 : f32
    %22 = vector.broadcast %cst_15 : f32 to vector<16x16x128xf32>
    %23 = arith.mulf %22, %21 : vector<16x16x128xf32>
    %cst_16 = arith.constant 0.707106769 : f32
    %24 = vector.broadcast %cst_16 : f32 to vector<16x16x128xf32>
    %25 = arith.mulf %21, %24 : vector<16x16x128xf32>
    %26 = math.erf %25 : vector<16x16x128xf32>
    %cst_17 = arith.constant 1.000000e+00 : f32
    %27 = vector.broadcast %cst_17 : f32 to vector<16x16x128xf32>
    %28 = arith.addf %27, %26 : vector<16x16x128xf32>
    %29 = arith.mulf %23, %28 : vector<16x16x128xf32>
    %30 = arith.truncf %15 : vector<16x16x128xf32> to vector<16x16x128xbf16>
    %31 = arith.truncf %29 : vector<16x16x128xf32> to vector<16x16x128xbf16>
    %c0_18 = arith.constant 0 : index
    %c0_19 = arith.constant 0 : index
    %32 = vector.load %arg5[%c0_18, %c0_19] : memref<16x16xbf16, #tpu.memory_space<vmem>>, vector<16x16xbf16>
    %33 = vector.shape_cast %32 : vector<16x16xbf16> to vector<1x16x16xbf16>
    %34 = vector.broadcast %33 : vector<1x16x16xbf16> to vector<16x16x16xbf16>
    %cst_20 = arith.constant dense<0.000000e+00> : vector<16x16x128xf32>
    %35 = tpu.matmul %34, %30, %cst_20 {dimension_numbers = #tpu.dot_dimension_numbers<[2], [1], [1], [2], [0, 0, 0, 1, 1, 2], [0], [0]>} : vector<16x16x16xbf16>, vector<16x16x128xbf16>, vector<16x16x128xf32> -> vector<16x16x128xf32>
    %c0_21 = arith.constant 0 : index
    %c0_22 = arith.constant 0 : index
    %36 = vector.load %arg7[%c0_21, %c0_22] : memref<16x128xf32, #tpu.memory_space<vmem>>, vector<16x128xf32>
    %37 = vector.shape_cast %36 : vector<16x128xf32> to vector<1x16x128xf32>
    %38 = vector.broadcast %37 : vector<1x16x128xf32> to vector<16x16x128xf32>
    %39 = arith.addf %35, %38 : vector<16x16x128xf32>
    %c0_23 = arith.constant 0 : index
    %c0_24 = arith.constant 0 : index
    %40 = vector.load %arg6[%c0_23, %c0_24] : memref<16x16xbf16, #tpu.memory_space<vmem>>, vector<16x16xbf16>
    %41 = vector.shape_cast %40 : vector<16x16xbf16> to vector<1x16x16xbf16>
    %42 = vector.broadcast %41 : vector<1x16x16xbf16> to vector<16x16x16xbf16>
    %cst_25 = arith.constant dense<0.000000e+00> : vector<16x16x128xf32>
    %43 = tpu.matmul %42, %31, %cst_25 {dimension_numbers = #tpu.dot_dimension_numbers<[2], [1], [1], [2], [0, 0, 0, 1, 1, 2], [0], [0]>} : vector<16x16x16xbf16>, vector<16x16x128xbf16>, vector<16x16x128xf32> -> vector<16x16x128xf32>
    %c0_26 = arith.constant 0 : index
    %c0_27 = arith.constant 0 : index
    %44 = vector.load %arg8[%c0_26, %c0_27] : memref<16x128xf32, #tpu.memory_space<vmem>>, vector<16x128xf32>
    %45 = vector.shape_cast %44 : vector<16x128xf32> to vector<1x16x128xf32>
    %46 = vector.broadcast %45 : vector<1x16x128xf32> to vector<16x16x128xf32>
    %47 = arith.addf %43, %46 : vector<16x16x128xf32>
    %48 = vector.shape_cast %30 : vector<16x16x128xbf16> to vector<256x128xbf16>
    %49 = arith.truncf %39 : vector<16x16x128xf32> to vector<16x16x128xbf16>
    %50 = vector.shape_cast %49 : vector<16x16x128xbf16> to vector<256x128xbf16>
    %c0_28 = arith.constant 0 : index
    %c0_29 = arith.constant 0 : index
    %51 = vector.load %arg9[%c0_28, %c0_29] : memref<128x128xbf16, #tpu.memory_space<vmem>>, vector<128x128xbf16>
    %cst_30 = arith.constant dense<0.000000e+00> : vector<256x128xf32>
    %52 = tpu.matmul %48, %51, %cst_30 {dimension_numbers = #tpu.dot_dimension_numbers<[1], [0], [0], [1], [0, 0, 1, 1], [], []>} : vector<256x128xbf16>, vector<128x128xbf16>, vector<256x128xf32> -> vector<256x128xf32>
    %c0_31 = arith.constant 0 : index
    %c0_32 = arith.constant 0 : index
    %53 = vector.load %arg10[%c0_31, %c0_32] : memref<128x128xbf16, #tpu.memory_space<vmem>>, vector<128x128xbf16>
    %cst_33 = arith.constant dense<0.000000e+00> : vector<256x128xf32>
    %54 = tpu.matmul %50, %53, %cst_33 {dimension_numbers = #tpu.dot_dimension_numbers<[1], [0], [0], [1], [0, 0, 1, 1], [], []>} : vector<256x128xbf16>, vector<128x128xbf16>, vector<256x128xf32> -> vector<256x128xf32>
    %55 = arith.addf %52, %54 : vector<256x128xf32>
    %56 = vector.shape_cast %55 : vector<256x128xf32> to vector<16x16x128xf32>
    %c0_34 = arith.constant 0 : index
    %c0_35 = arith.constant 0 : index
    %c0_36 = arith.constant 0 : index
    %c0_37 = arith.constant 0 : index
    %57 = vector.load %arg12[%c0_34, %c0_35, %c0_36, %c0_37] : memref<1x16x16x128xf32, #tpu.memory_space<vmem>>, vector<1x16x16x128xf32>
    %58 = vector.shape_cast %57 : vector<1x16x16x128xf32> to vector<16x16x128xf32>
    %59 = vector.shape_cast %56 : vector<16x16x128xf32> to vector<1x16x16x128xf32>
    tpu.vector_store %arg12[%c0_34, %c0_35, %c0_36, %c0_37], %59 {strides = array<i32>} : memref<1x16x16x128xf32, #tpu.memory_space<vmem>>, vector<1x16x16x128xf32>,
    %60 = arith.truncf %47 : vector<16x16x128xf32> to vector<16x16x128xbf16>
    %61 = vector.shape_cast %60 : vector<16x16x128xbf16> to vector<256x128xbf16>
    %c0_38 = arith.constant 0 : index
    %c0_39 = arith.constant 0 : index
    %62 = vector.load %arg11[%c0_38, %c0_39] : memref<128x128xbf16, #tpu.memory_space<vmem>>, vector<128x128xbf16>
    %cst_40 = arith.constant dense<0.000000e+00> : vector<256x128xf32>
    %63 = tpu.matmul %61, %62, %cst_40 {dimension_numbers = #tpu.dot_dimension_numbers<[1], [0], [0], [1], [0, 0, 1, 1], [], []>} : vector<256x128xbf16>, vector<128x128xbf16>, vector<256x128xf32> -> vector<256x128xf32>
    %64 = vector.shape_cast %63 : vector<256x128xf32> to vector<16x16x128xf32>
    %c0_41 = arith.constant 0 : index
    %c0_42 = arith.constant 0 : index
    %c0_43 = arith.constant 0 : index
    %c0_44 = arith.constant 0 : index
    %65 = vector.load %arg13[%c0_41, %c0_42, %c0_43, %c0_44] : memref<1x16x16x128xf32, #tpu.memory_space<vmem>>, vector<1x16x16x128xf32>
    %66 = vector.shape_cast %65 : vector<1x16x16x128xf32> to vector<16x16x128xf32>
    %67 = vector.shape_cast %64 : vector<16x16x128xf32> to vector<1x16x16x128xf32>
    tpu.vector_store %arg13[%c0_41, %c0_42, %c0_43, %c0_44], %67 {strides = array<i32>} : memref<1x16x16x128xf32, #tpu.memory_space<vmem>>, vector<1x16x16x128xf32>,
    return
  }
  func.func @transform_0(%arg0: i32) -> (i32, i32, i32, i32) {
    %c0_i32 = arith.constant 0 : i32
    %c0_i32_0 = arith.constant 0 : i32
    %c0_i32_1 = arith.constant 0 : i32
    %c0_i32_2 = arith.constant 0 : i32
    return %arg0, %c0_i32, %c0_i32_0, %c0_i32_1 : i32, i32, i32, i32
  }
  func.func @transform_1(%arg0: i32) -> (i32, i32, i32, i32) {
    %c0_i32 = arith.constant 0 : i32
    %c0_i32_0 = arith.constant 0 : i32
    %c0_i32_1 = arith.constant 0 : i32
    %c0_i32_2 = arith.constant 0 : i32
    return %arg0, %c0_i32, %c0_i32_0, %c0_i32_1 : i32, i32, i32, i32
  }
  func.func @transform_2(%arg0: i32) -> (i32, i32, i32) {
    %c0_i32 = arith.constant 0 : i32
    %c0_i32_0 = arith.constant 0 : i32
    %c0_i32_1 = arith.constant 0 : i32
    %c0_i32_2 = arith.constant 0 : i32
    return %c0_i32, %c0_i32_0, %c0_i32_1 : i32, i32, i32
  }
  func.func @transform_3(%arg0: i32) -> (i32, i32, i32) {
    %c0_i32 = arith.constant 0 : i32
    %c0_i32_0 = arith.constant 0 : i32
    %c0_i32_1 = arith.constant 0 : i32
    %c0_i32_2 = arith.constant 0 : i32
    return %c0_i32, %c0_i32_0, %c0_i32_1 : i32, i32, i32
  }
  func.func @transform_4(%arg0: i32) -> (i32, i32) {
    %c0_i32 = arith.constant 0 : i32
    %c0_i32_0 = arith.constant 0 : i32
    %c0_i32_1 = arith.constant 0 : i32
    return %c0_i32, %c0_i32_0 : i32, i32
  }
  func.func @transform_5(%arg0: i32) -> (i32, i32) {
    %c0_i32 = arith.constant 0 : i32
    %c0_i32_0 = arith.constant 0 : i32
    %c0_i32_1 = arith.constant 0 : i32
    return %c0_i32, %c0_i32_0 : i32, i32
  }
  func.func @transform_6(%arg0: i32) -> (i32, i32) {
    %c0_i32 = arith.constant 0 : i32
    %c0_i32_0 = arith.constant 0 : i32
    %c0_i32_1 = arith.constant 0 : i32
    return %c0_i32, %c0_i32_0 : i32, i32
  }
  func.func @transform_7(%arg0: i32) -> (i32, i32) {
    %c0_i32 = arith.constant 0 : i32
    %c0_i32_0 = arith.constant 0 : i32
    %c0_i32_1 = arith.constant 0 : i32
    return %c0_i32, %c0_i32_0 : i32, i32
  }
  func.func @transform_8(%arg0: i32) -> (i32, i32) {
    %c0_i32 = arith.constant 0 : i32
    %c0_i32_0 = arith.constant 0 : i32
    %c0_i32_1 = arith.constant 0 : i32
    return %c0_i32, %c0_i32_0 : i32, i32
  }
  func.func @transform_9(%arg0: i32) -> (i32, i32) {
    %c0_i32 = arith.constant 0 : i32
    %c0_i32_0 = arith.constant 0 : i32
    %c0_i32_1 = arith.constant 0 : i32
    return %c0_i32, %c0_i32_0 : i32, i32
  }
  func.func @transform_10(%arg0: i32) -> (i32, i32) {
    %c0_i32 = arith.constant 0 : i32
    %c0_i32_0 = arith.constant 0 : i32
    %c0_i32_1 = arith.constant 0 : i32
    return %c0_i32, %c0_i32_0 : i32, i32
  }
  func.func @transform_11(%arg0: i32) -> (i32, i32, i32, i32) {
    %c0_i32 = arith.constant 0 : i32
    %c0_i32_0 = arith.constant 0 : i32
    %c0_i32_1 = arith.constant 0 : i32
    %c0_i32_2 = arith.constant 0 : i32
    return %arg0, %c0_i32, %c0_i32_0, %c0_i32_1 : i32, i32, i32, i32
  }
  func.func @transform_12(%arg0: i32) -> (i32, i32, i32, i32) {
    %c0_i32 = arith.constant 0 : i32
    %c0_i32_0 = arith.constant 0 : i32
    %c0_i32_1 = arith.constant 0 : i32
    %c0_i32_2 = arith.constant 0 : i32
    return %arg0, %c0_i32, %c0_i32_0, %c0_i32_1 : i32, i32, i32, i32
  }
}

</mosaic_0001>

<bundles_post_ra>
// kernel: smlp_block.1
= control target key start
LH: loop header
LB: loop body
LE: loop exit
PB: predicated region body
PF: predicated region fallthrough
CT: control target
= control target key end

     0   :  { %s6244_s0 = inlined_call_operand.hbm [shape: f32[2,16,16,128], index: 0, kind: input, shape index: {}]   ;;  %s6245_s1 = inlined_call_operand.hbm [shape: f32[2,16,16,128], index: 1, kind: input, shape index: {}]   ;;  %s6246_s2 = inlined_call_operand.hbm [shape: f32[1,1,128], index: 2, kind: input, shape index: {}]   ;;  %s6247_s3 = inlined_call_operand.hbm [shape: f32[1,1,128], index: 3, kind: input, shape index: {}]   ;;  %s6248_s4 = inlined_call_operand.hbm [shape: bf16[16,16], index: 4, kind: input, shape index: {}]   ;;  %s6249_s5 = inlined_call_operand.hbm [shape: bf16[16,16], index: 5, kind: input, shape index: {}]   ;;  %s6250_s6 = inlined_call_operand.hbm [shape: f32[16,128], index: 6, kind: input, shape index: {}]   ;;  %s6251_s7 = inlined_call_operand.hbm [shape: f32[16,128], index: 7, kind: input, shape index: {}]   ;;  %s6252_s8 = inlined_call_operand.hbm [shape: bf16[128,128], index: 8, kind: input, shape index: {}]   ;;  %s6253_s9 = inlined_call_operand.hbm [shape: bf16[128,128], index: 9, kind: input, shape index: {}]   ;;  %s6254_s10 = inlined_call_operand.hbm [shape: bf16[128,128], index: 10, kind: input, shape index: {}]   ;;  %s6255_s11 = inlined_call_operand.hbm [shape: f32[2,16,16,128], index: 11, kind: output, shape index: {0}]   ;;  %s6256_s12 = inlined_call_operand.hbm [shape: f32[2,16,16,128], index: 12, kind: output, shape index: {1}]  }
   0x1   :  { %6270 = sst [smem:[#allocation33_spill]] %s6244_s0 }
   0x2   :  { %6271 = sst [smem:[#allocation34_spill]] %s6245_s1 }
   0x3   :  { %6272 = sst [smem:[#allocation35_spill]] %s6246_s2 }
   0x4   :  { %6273 = sst [smem:[#allocation36_spill]] %s6247_s3 }
   0x5   :  { %6274 = sst [smem:[#allocation37_spill]] %s6248_s4 }
   0x6   :  { %6275 = sst [smem:[#allocation38_spill]] %s6249_s5 }
   0x7   :  { %6276 = sst [smem:[#allocation39_spill]] %s6250_s6 }
   0x8   :  { %6277 = sst [smem:[#allocation40_spill]] %s6251_s7 }
   0x9   :  { %6278 = sst [smem:[#allocation41_spill]] %s6252_s8 }
   0xa   :  { %6279 = sst [smem:[#allocation42_spill]] %s6255_s11 }
   0xb   :  { %6280 = sst [smem:[#allocation43_spill]] %s6256_s12 }
   0xc   :  { %18 = vsyncpa [#allocation3], 0 }
   0xd   :  { %20 = vsyncpa [#allocation3 + $0x1], 0 }
   0xe   :  { %21 = vsyncpa [#allocation6], 0 }
   0xf   :  { %23 = vsyncpa [#allocation6 + $0x1], 0 }
  0x10   :  { %24 = vsyncpa [#allocation9], 0 }
  0x11   :  { %25 = vsyncpa [#allocation12], 0 }
  0x12   :  { %26 = vsyncpa [#allocation15], 0 }
  0x13   :  { %27 = vsyncpa [#allocation18], 0 }
  0x14   :  { %28 = vsyncpa [#allocation4], 0 }
  0x15   :  { %30 = vsyncpa [#allocation4 + $0x1], 0 }
  0x16   :  { %31 = vsyncpa [#allocation22], 0 }
  0x17   :  { %33 = vsyncpa [#allocation22 + $0x1], 0  ;;  %s4981_s21 = smov 0   ;;  %s4983_s22 = smov 0  }
  0x18   :  { %s4985_s23 = smov 0   ;;  %s4987_s24 = smov 0  }
  0x19 LB: > { %s4895_s25 = smov [#allocation7]   ;;  %s5002_s27 = sadd.s32 4294967295, %s4893_s24   ;;  %s4893_s24 = sphi %s4987_s24, %s6322_s24   ;;  %s4889_s23 = sphi %s4985_s23, %s6321_s23   ;;  %s4885_s22 = sphi %s4983_s22, %s6320_s22   ;;  %s4881_s21 = sphi %s4981_s21, %s6319_s21  }
  0x1a   : > { %s350_s26 = sshll.u32 %s4895_s25, 4  ;;  %p3525_p0 = scmp.ge.s32.totalorder %s4893_s24, 1  ;;  %s5007_s26 = int_to_ptr.vmem [resolvable:$true] %s350_s26 }
  0x1b   : > { %p6261_p1 = scmp.eq.s32.totalorder %s5002_s27, 0  ;;  %p337_p2 = scmp.lt.s32.totalorder %s4893_s24, 3 }
  0x1c   : > { %s4896_s29 = smov [#allocation8]   ;;  %s4897_s14 = smov [#allocation11]  }
  0x1d   : > { %p5009_p3 = pnand %p3525_p0, %p337_p2  ;;  %s361_s30 = sshll.u32 %s4896_s29, 4  ;;  %s5016_s30 = int_to_ptr.vmem [resolvable:$true] %s361_s30 }
  0x1e   : > { %s384_s15 = sshll.u32 %s4897_s14, 4  ;;  %s6284_s2 = sld [smem:[#allocation35_spill]]  ;;  %s5024_s15 = int_to_ptr.vmem [resolvable:$true] %s384_s15 }
  0x1f   : > { %s6281_s28 = scalar_select %p5009_p3, 1, 0 }
  0x20   : > { %p4192_p5 = pneg %p5009_p3 }
  0x21   : > { %6282 = sst [smem:[#allocation32_spill]] %s6281_s28 }
  0x22   : > { %p5020_p6 = pnand %p4192_p5, %p6261_p1 }
  0x24   : > { %s4459_s18 = scalar_lea.hbm %s6284_s2, 16  ;;  %p5034_p8 = pneg %p5020_p6 }
  0x25   : > { %p4460_p7 = scmp.ne.s32.totalorder %s6284_s2, %s4459_s18  ;;  %p4466_p11 = scmp.lt.u32.totalorder %s4459_s18, %s6284_s2 }
  0x27   : > { %p4462_p9 = pnand %p5034_p8, %p4460_p7 }
  0x29   : > { %p4463_p10 = pneg %p4462_p9 }
  0x2b   : > { %p4468_p12 = pnand %p4466_p11, %p4463_p10 }
  0x2d   : > { %4471 = shalt.err (!%p4468_p12)
}
  0x2e   : > { %s4472_s16 = scalar_lea.vmem %s5007_s26, 16  ;;  %s4479_s17 = scalar_lea.vmem %s5007_s26, 32 }
  0x2f   : > { %p4473_p13 = scmp.ne.s32.totalorder %s5007_s26, %s4472_s16  ;;  %p4480_p5 = scmp.lt.s32.totalorder %s5007_s26, %s5007_s26 }
  0x30   : > { %p4481_p7 = scmp.lt.s32.totalorder %s4479_s17, %s4472_s16 }
  0x31   : > { %p4475_p0 = pnand %p4473_p13, %p5034_p8 }
  0x32   : > { %p4482_p9 = por %p4481_p7, %p4480_p5 }
  0x33   : > { %p4476_p2 = pneg %p4475_p0 }
  0x35   : > { %p4483_p4 = pnand %p4482_p9, %p4476_p2 }
  0x37   : > { %4486 = shalt.err (!%p4483_p4)
}
  0x38   : > { %4195 = dma.hbm_to_vmem [thread:$0]  (!%p5020_p6), %s6284_s2, 16, %s5007_s26, [#allocation6]  }
  0x39   : > { %s6286_s3 = sld [smem:[#allocation36_spill]] }
  0x3f   : > { %s4487_s14 = scalar_lea.hbm %s6286_s3, 16 }
  0x40   : > { %p4488_p10 = scmp.ne.s32.totalorder %s6286_s3, %s4487_s14  ;;  %p4494_p4 = scmp.lt.u32.totalorder %s4487_s14, %s6286_s3 }
  0x42   : > { %p4490_p11 = pnand %p4488_p10, %p5034_p8 }
  0x44   : > { %p4491_p12 = pneg %p4490_p11 }
  0x46   : > { %p4496_p13 = pnand %p4494_p4, %p4491_p12 }
  0x48   : > { %4499 = shalt.err (!%p4496_p13)
}
  0x49   : > { %s4500_s26 = scalar_lea.vmem %s5016_s30, 16  ;;  %s4507_s11 = scalar_lea.vmem %s5016_s30, 32 }
  0x4a   : > { %p4501_p0 = scmp.ne.s32.totalorder %s5016_s30, %s4500_s26  ;;  %p4508_p7 = scmp.lt.s32.totalorder %s5016_s30, %s5016_s30 }
  0x4b   : > { %p4509_p9 = scmp.lt.s32.totalorder %s4507_s11, %s4500_s26 }
  0x4c   : > { %p4503_p2 = pnand %p4501_p0, %p5034_p8 }
  0x4d   : > { %p4510_p10 = por %p4509_p9, %p4508_p7 }
  0x4e   : > { %p4504_p5 = pneg %p4503_p2 }
  0x50   : > { %p4511_p11 = pnand %p4510_p10, %p4504_p5 }
  0x52   : > { %4514 = shalt.err (!%p4511_p11)
}
  0x53   : > { %4198 = dma.hbm_to_vmem [thread:$0]  (!%p5020_p6), %s6286_s3, 16, %s5016_s30, [#allocation9]  }
  0x54   : > { %s6287_s5 = sld [smem:[#allocation38_spill]] }
  0x5a   : > { %s4515_s29 = scalar_lea.hbm %s6287_s5, 128 }
  0x5b   : > { %p4516_p12 = scmp.ne.s32.totalorder %s6287_s5, %s4515_s29  ;;  %p4522_p0 = scmp.lt.u32.totalorder %s4515_s29, %s6287_s5 }
  0x5d   : > { %p4518_p4 = pnand %p4516_p12, %p5034_p8 }
  0x5f   : > { %p4519_p13 = pneg %p4518_p4 }
  0x61   : > { %p4524_p2 = pnand %p4522_p0, %p4519_p13 }
  0x63   : > { %4527 = shalt.err (!%p4524_p2)
}
  0x64   : > { %s4528_s30 = scalar_lea.vmem %s5024_s15, 128  ;;  %p4536_p10 = scmp.lt.s32.totalorder %s5024_s15, %s5024_s15 }
  0x65   : > { %p4529_p5 = scmp.ne.s32.totalorder %s5024_s15, %s4528_s30  ;;  %p4537_p11 = scmp.lt.s32.totalorder %s4528_s30, %s4528_s30 }
  0x67   : > { %p4531_p7 = pnand %p4529_p5, %p5034_p8  ;;  %p4538_p12 = por %p4537_p11, %p4536_p10 }
  0x69   : > { %p4532_p9 = pneg %p4531_p7 }
  0x6b   : > { %p4539_p4 = pnand %p4538_p12, %p4532_p9 }
  0x6d   : > { %4542 = shalt.err (!%p4539_p4)
}
  0x6e   : > { %s6265_s11 = smov 64   ;;  %s4899_s12 = smov 4  }
  0x6f   : > { %4204 = dma.hbm_to_vmem [thread:$0]  (!%p5020_p6), %s6287_s5, 128, %s5024_s15, [#allocation12], %s6265_s11, %s6265_s11, %s4899_s12  }
  0x70   : > { %s4900_s20 = smov [#allocation14]   ;;  %s4901_s14 = smov [#allocation17]  }
  0x71   : > { %s410_s29 = sshll.u32 %s4900_s20, 4  ;;  %s436_s16 = sshll.u32 %s4901_s14, 4  ;;  %s411_s29 = int_to_ptr.vmem [resolvable:$true] %s410_s29  ;;  %s437_s16 = int_to_ptr.vmem [resolvable:$true] %s436_s16 }
  0x72   : > { %s6288_s7 = sld [smem:[#allocation40_spill]] }
  0x78   : > { %s4543_s30 = scalar_lea.hbm %s6288_s7, 256 }
  0x79   : > { %p4544_p13 = scmp.ne.s32.totalorder %s6288_s7, %s4543_s30  ;;  %p4550_p5 = scmp.lt.u32.totalorder %s4543_s30, %s6288_s7 }
  0x7b   : > { %p4546_p0 = pnand %p4544_p13, %p5034_p8 }
  0x7d   : > { %p4547_p2 = pneg %p4546_p0 }
  0x7f   : > { %p4552_p7 = pnand %p4550_p5, %p4547_p2 }
  0x81   : > { %4555 = shalt.err (!%p4552_p7)
}
  0x82   : > { %s4556_s15 = scalar_lea.vmem %s411_s29, 256  ;;  %p4564_p12 = scmp.lt.s32.totalorder %s411_s29, %s411_s29 }
  0x83   : > { %p4557_p9 = scmp.ne.s32.totalorder %s411_s29, %s4556_s15  ;;  %p4565_p4 = scmp.lt.s32.totalorder %s4556_s15, %s4556_s15 }
  0x85   : > { %p4559_p10 = pnand %p4557_p9, %p5034_p8  ;;  %p4566_p1 = por %p4565_p4, %p4564_p12 }
  0x87   : > { %p4560_p11 = pneg %p4559_p10 }
  0x89   : > { %p4567_p3 = pnand %p4566_p1, %p4560_p11 }
  0x8b   : > { %4570 = shalt.err (!%p4567_p3)
}
  0x8c   : > { %s6263_s2 = smov 128   ;;  %s6267_s3 = smov 8  }
  0x8d   : > { %4210 = dma.hbm_to_vmem [thread:$0]  (!%p5020_p6), %s6288_s7, 256, %s411_s29, [#allocation15], %s6263_s2, %s6263_s2, %s6267_s3  }
  0x8e   : > { %s4571_s20 = scalar_lea.hbm %s6253_s9, 1024 }
  0x8f   : > { %p4572_p1 = scmp.ne.s32.totalorder %s6253_s9, %s4571_s20  ;;  %p4578_p0 = scmp.lt.u32.totalorder %s4571_s20, %s6253_s9 }
  0x91   : > { %p4574_p3 = pnand %p4572_p1, %p5034_p8 }
  0x93   : > { %p4575_p13 = pneg %p4574_p3 }
  0x95   : > { %p4580_p2 = pnand %p4578_p0, %p4575_p13 }
  0x97   : > { %4583 = shalt.err (!%p4580_p2)
}
  0x98   : > { %s4584_s15 = scalar_lea.vmem %s437_s16, 1024  ;;  %p4592_p10 = scmp.lt.s32.totalorder %s437_s16, %s437_s16 }
  0x99   : > { %p4585_p5 = scmp.ne.s32.totalorder %s437_s16, %s4584_s15  ;;  %p4593_p11 = scmp.lt.s32.totalorder %s4584_s15, %s4584_s15 }
  0x9b   : > { %p4587_p7 = pnand %p4585_p5, %p5034_p8  ;;  %p4594_p12 = por %p4593_p11, %p4592_p10 }
  0x9d   : > { %p4588_p9 = pneg %p4587_p7 }
  0x9f   : > { %p4595_p4 = pnand %p4594_p12, %p4588_p9 }
  0xa1   : > { %4598 = shalt.err (!%p4595_p4)
}
  0xa2   : > { %4216 = dma.hbm_to_vmem [thread:$0]  (!%p5020_p6), %s6253_s9, 1024, %s437_s16, [#allocation18], %s6265_s11, %s6265_s11, %s4899_s12  }
  0xa3   : > { %s4904_s28 = smov [#allocation10]   ;;  %s4905_s19 = smov [#allocation13]  }
  0xa4   : > { %s371_s18 = sshll.u32 %s4904_s28, 4  ;;  %s397_s20 = sshll.u32 %s4905_s19, 4  ;;  %s372_s18 = int_to_ptr.vmem [resolvable:$true] %s371_s18  ;;  %s398_s20 = int_to_ptr.vmem [resolvable:$true] %s397_s20 }
  0xa5   : > { %s6289_s4 = sld [smem:[#allocation37_spill]] }
  0xab   : > { %s4599_s26 = scalar_lea.hbm %s6289_s4, 128 }
  0xac   : > { %p4600_p1 = scmp.ne.s32.totalorder %s6289_s4, %s4599_s26  ;;  %p4606_p0 = scmp.lt.u32.totalorder %s4599_s26, %s6289_s4 }
  0xae   : > { %p4602_p3 = pnand %p4600_p1, %p5034_p8 }
  0xb0   : > { %p4603_p13 = pneg %p4602_p3 }
  0xb2   : > { %p4608_p2 = pnand %p4606_p0, %p4603_p13 }
  0xb4   : > { %4611 = shalt.err (!%p4608_p2)
}
  0xb5   : > { %s4612_s16 = scalar_lea.vmem %s372_s18, 128  ;;  %p4620_p10 = scmp.lt.s32.totalorder %s372_s18, %s372_s18 }
  0xb6   : > { %p4613_p5 = scmp.ne.s32.totalorder %s372_s18, %s4612_s16  ;;  %p4621_p11 = scmp.lt.s32.totalorder %s4612_s16, %s4612_s16 }
  0xb8   : > { %p4615_p7 = pnand %p4613_p5, %p5034_p8  ;;  %p4622_p12 = por %p4621_p11, %p4620_p10 }
  0xba   : > { %p4616_p9 = pneg %p4615_p7 }
  0xbc   : > { %p4623_p4 = pnand %p4622_p12, %p4616_p9 }
  0xbe   : > { %4626 = shalt.err (!%p4623_p4)
}
  0xbf   : > { %4201 = dma.hbm_to_vmem [thread:$0]  (!%p5020_p6), %s6289_s4, 128, %s372_s18, [#allocation9], %s6265_s11, %s6265_s11, %s4899_s12  }
  0xc0   : > { %s6290_s6 = sld [smem:[#allocation39_spill]] }
  0xc6   : > { %s4627_s14 = scalar_lea.hbm %s6290_s6, 256 }
  0xc7   : > { %p4628_p1 = scmp.ne.s32.totalorder %s6290_s6, %s4627_s14  ;;  %p4634_p0 = scmp.lt.u32.totalorder %s4627_s14, %s6290_s6 }
  0xc9   : > { %p4630_p3 = pnand %p4628_p1, %p5034_p8 }
  0xcb   : > { %p4631_p13 = pneg %p4630_p3 }
  0xcd   : > { %p4636_p2 = pnand %p4634_p0, %p4631_p13 }
  0xcf   : > { %4639 = shalt.err (!%p4636_p2)
}
  0xd0   : > { %s4640_s29 = scalar_lea.vmem %s398_s20, 256  ;;  %p4648_p10 = scmp.lt.s32.totalorder %s398_s20, %s398_s20 }
  0xd1   : > { %p4641_p5 = scmp.ne.s32.totalorder %s398_s20, %s4640_s29  ;;  %p4649_p11 = scmp.lt.s32.totalorder %s4640_s29, %s4640_s29 }
  0xd3   : > { %p4643_p7 = pnand %p4641_p5, %p5034_p8  ;;  %p4650_p12 = por %p4649_p11, %p4648_p10 }
  0xd5   : > { %p4644_p9 = pneg %p4643_p7 }
  0xd7   : > { %p4651_p4 = pnand %p4650_p12, %p4644_p9 }
  0xd9   : > { %4654 = shalt.err (!%p4651_p4)
}
  0xda   : > { %s6291_s18 = smov 128   ;;  %s4906_s1 = smov [#allocation16]  }
  0xdb   : > { %4207 = dma.hbm_to_vmem [thread:$0]  (!%p5020_p6), %s6290_s6, 256, %s398_s20, [#allocation12], %s6291_s18, %s6291_s18, %s6267_s3  }
  0xdc   : > { %s423_s28 = sshll.u32 %s4906_s1, 4  ;;  %s4907_s19 = smov [#allocation19]   ;;  %s424_s28 = int_to_ptr.vmem [resolvable:$true] %s423_s28 }
  0xdd   : > { %s449_s14 = sshll.u32 %s4907_s19, 4  ;;  %s6292_s8 = sld [smem:[#allocation41_spill]]  ;;  %s450_s14 = int_to_ptr.vmem [resolvable:$true] %s449_s14 }
  0xe3   : > { %s4655_s30 = scalar_lea.hbm %s6292_s8, 1024 }
  0xe4   : > { %p4656_p1 = scmp.ne.s32.totalorder %s6292_s8, %s4655_s30  ;;  %p4662_p0 = scmp.lt.u32.totalorder %s4655_s30, %s6292_s8 }
  0xe6   : > { %p4658_p3 = pnand %p4656_p1, %p5034_p8 }
  0xe8   : > { %p4659_p13 = pneg %p4658_p3 }
  0xea   : > { %p4664_p2 = pnand %p4662_p0, %p4659_p13 }
  0xec   : > { %4667 = shalt.err (!%p4664_p2)
}
  0xed   : > { %s4668_s20 = scalar_lea.vmem %s424_s28, 1024  ;;  %p4676_p10 = scmp.lt.s32.totalorder %s424_s28, %s424_s28 }
  0xee   : > { %p4669_p5 = scmp.ne.s32.totalorder %s424_s28, %s4668_s20  ;;  %p4677_p11 = scmp.lt.s32.totalorder %s4668_s20, %s4668_s20 }
  0xf0   : > { %p4671_p7 = pnand %p4669_p5, %p5034_p8  ;;  %p4678_p12 = por %p4677_p11, %p4676_p10 }
  0xf2   : > { %p4672_p9 = pneg %p4671_p7 }
  0xf4   : > { %p4679_p4 = pnand %p4678_p12, %p4672_p9 }
  0xf6   : > { %4682 = shalt.err (!%p4679_p4)
}
  0xf7   : > { %s6293_s2 = smov 64   ;;  %s4683_s26 = scalar_lea.hbm %s6254_s10, 1024 }
  0xf8   : > { %4213 = dma.hbm_to_vmem [thread:$0]  (!%p5020_p6), %s6292_s8, 1024, %s424_s28, [#allocation15], %s6293_s2, %s6293_s2, %s4899_s12  }
  0xf9   : > { %p4684_p1 = scmp.ne.s32.totalorder %s6254_s10, %s4683_s26  ;;  %p4690_p0 = scmp.lt.u32.totalorder %s4683_s26, %s6254_s10 }
  0xfb   : > { %p4686_p3 = pnand %p4684_p1, %p5034_p8 }
  0xfd   : > { %p4687_p13 = pneg %p4686_p3 }
  0xff   : > { %p4692_p2 = pnand %p4690_p0, %p4687_p13 }
 0x101   : > { %4695 = shalt.err (!%p4692_p2)
}
 0x102   : > { %s4696_s20 = scalar_lea.vmem %s450_s14, 1024  ;;  %p4704_p10 = scmp.lt.s32.totalorder %s450_s14, %s450_s14 }
 0x103   : > { %p4697_p5 = scmp.ne.s32.totalorder %s450_s14, %s4696_s20  ;;  %p4705_p11 = scmp.lt.s32.totalorder %s4696_s20, %s4696_s20 }
 0x105   : > { %p4699_p7 = pnand %p4697_p5, %p5034_p8  ;;  %p4706_p12 = por %p4705_p11, %p4704_p10 }
 0x107   : > { %p4700_p9 = pneg %p4699_p7 }
 0x109   : > { %p4707_p4 = pnand %p4706_p12, %p4700_p9 }
 0x10b   : > { %4710 = shalt.err (!%p4707_p4)
}
 0x10c   : > { %4219 = dma.hbm_to_vmem [thread:$0]  (!%p5020_p6), %s6254_s10, 1024, %s450_s14, [#allocation18], %s6293_s2, %s6293_s2, %s4899_s12  }
 0x10d   : > { %s3524_s13 = sadd.s32 4294967294, %s4893_s24   ;;  %s5234_s25 = sadd.s32 1, %s4893_s24  }
 0x10e   : > { %s46_s1 = sadd.s32 1, %s4889_s23  ;;  %s43_s19 = ssub.s32 %s4893_s24, %s5234_s25 }
 0x10f   : > { %p53_p8 = scmp.ne.s32.totalorder %s4889_s23, %s4885_s22  ;;  %p44_p1 = scmp.eq.s32.totalorder %s43_s19, 0 }
 0x110   : > { %p54_p3 = scmp.eq.s32.totalorder %s4893_s24, 0  ;;  %p59_p13 = scmp.ne.s32.totalorder %s4885_s22, %s4881_s21 }
 0x111   : > { %p298_p0 = scmp.eq.s32.totalorder %s5002_s27, 1  ;;  %p6294_p5 = scmp.eq.s32.totalorder %s5002_s27, 0 }
 0x112   : > { %s5246_s17 = scalar_select %p44_p1, %s4889_s23, %s46_s1  }
 0x113   : > { %p55_p2 = por %p54_p3, %p53_p8  ;;  %p5250_p7 = por %p6294_p5, %p59_p13 }
 0x114   : > { %p5254_p6 = por %p298_p0, %p53_p8  ;;  %p304_p9 = scmp.eq.s32.totalorder %s3524_s13, 1 }
 0x115   : > { %p4243_p10 = scmp.lt.s32.totalorder %s4893_s24, 2  ;;  %s463_s14 = sand.u32 1, %s4889_s23  }
 0x116   : > { %s6296_s12 = scalar_select %p5254_p6, 1, 0 }
 0x117   : > { %p5260_p11 = por %p304_p9, %p59_p13  ;;  %s5264_s30 = sshll.u32 %s463_s14, 8 }
 0x118   : > { %s3624_s15 = sshll.u32 %s4893_s24, 12  ;;  %s6298_s0 = sld [smem:[#allocation33_spill]] }
 0x119   : > { %s6297_s2 = scalar_select %p5260_p11, 1, 0 }
 0x11a   : > { %s467_s28 = scalar_lea.vmem [#allocation2], %s5264_s30  ;;  %p5273_p12 = pnand %p4243_p10, %p55_p2 }
 0x11b   : > { %s474_s11 = sshll.u32 %s467_s28, 4  ;;  %s6300_s3 = sld [smem:[#allocation34_spill]]  ;;  %s5277_s11 = int_to_ptr.vmem [resolvable:$true] %s474_s11 }
 0x11c   : > { %s5284_s16 = scalar_lea.sflag [#allocation3], %s463_s14  ;;  %p4713_p8 = pneg %p5273_p12 }
 0x11e   : > { %s5270_s20 = scalar_lea.hbm %s6298_s0, %s3624_s15  ;;  %s4716_s6 = scalar_lea.hbm %s6298_s0, 8192 }
 0x11f   : > { %s4711_s4 = scalar_lea.hbm %s5270_s20, 4096  ;;  %p4717_p13 = scmp.lt.u32.totalorder %s5270_s20, %s6298_s0 }
 0x120   : > { %p4712_p4 = scmp.ne.s32.totalorder %s5270_s20, %s4711_s4  ;;  %p4718_p0 = scmp.lt.u32.totalorder %s4716_s6, %s4711_s4 }
 0x121   : > { %s5282_s29 = scalar_lea.hbm %s6300_s3, %s3624_s15  ;;  %p4720_p5 = scmp.lt.u32.totalorder %s4711_s4, %s5270_s20 }
 0x122   : > { %p4714_p1 = pnand %p4713_p8, %p4712_p4  ;;  %p4719_p2 = por %p4718_p0, %p4717_p13 }
 0x124   : > { %p4715_p3 = pneg %p4714_p1  ;;  %p4721_p9 = por %p4720_p5, %p4719_p2 }
 0x126   : > { %p4722_p10 = pnand %p4721_p9, %p4715_p3 }
 0x128   : > { %4725 = shalt.err (!%p4722_p10)
}
 0x129   : > { %s4726_s14 = scalar_lea.vmem %s5277_s11, 4096  ;;  %s4908_s5 = smov [#allocation2]  }
 0x12a   : > { %p4727_p4 = scmp.ne.s32.totalorder %s5277_s11, %s4726_s14  ;;  %s4731_s15 = sshll.u32 %s4908_s5, 4  ;;  %s4732_s15 = int_to_ptr.vmem [resolvable:$false] %s4731_s15 }
 0x12b   : > { %s4733_s7 = scalar_lea.vmem %s4732_s15, 8192  ;;  %p4734_p6 = scmp.lt.s32.totalorder %s5277_s11, %s4732_s15 }
 0x12c   : > { %p4729_p1 = pnand %p4727_p4, %p4713_p8  ;;  %p4735_p13 = scmp.lt.s32.totalorder %s4733_s7, %s4726_s14 }
 0x12e   : > { %p4730_p11 = pneg %p4729_p1  ;;  %p4736_p0 = por %p4735_p13, %p4734_p6 }
 0x130   : > { %p4737_p2 = pnand %p4736_p0, %p4730_p11 }
 0x132   : > { %4740 = shalt.err (!%p4737_p2)
}
 0x133   : > { %s6301_s4 = smov 8   ;;  %s488_s6 = scalar_lea.vmem [#allocation5], %s5264_s30 }
 0x134   : > { %4223 = dma.hbm_to_vmem [thread:$0]  (!%p5273_p12), %s5270_s20, 4096, %s5277_s11, %s5284_s16, %s6291_s18, %s6291_s18, %s6301_s4  }
 0x135   : > { %s495_s8 = sshll.u32 %s488_s6, 4  ;;  %s484_s1 = sand.u32 1, %s4893_s24   ;;  %s5317_s8 = int_to_ptr.vmem [resolvable:$true] %s495_s8 }
 0x136   : > { %s5319_s19 = scalar_lea.sflag [#allocation6], %s484_s1  ;;  %s4741_s28 = scalar_lea.hbm %s5282_s29, 4096 }
 0x137   : > { %p4742_p6 = scmp.ne.s32.totalorder %s5282_s29, %s4741_s28  ;;  %s4746_s15 = scalar_lea.hbm %s6300_s3, 8192 }
 0x138   : > { %p4747_p5 = scmp.lt.u32.totalorder %s5282_s29, %s6300_s3  ;;  %p4748_p9 = scmp.lt.u32.totalorder %s4746_s15, %s4741_s28 }
 0x139   : > { %p4744_p11 = pnand %p4742_p6, %p4713_p8  ;;  %p4750_p4 = scmp.lt.u32.totalorder %s4741_s28, %s5282_s29 }
 0x13a   : > { %p4749_p10 = por %p4748_p9, %p4747_p5 }
 0x13b   : > { %p4745_p3 = pneg %p4744_p11 }
 0x13c   : > { %p4751_p1 = por %p4750_p4, %p4749_p10 }
 0x13e   : > { %p4752_p13 = pnand %p4751_p1, %p4745_p3 }
 0x140   : > { %4755 = shalt.err (!%p4752_p13)
}
 0x141   : > { %s4756_s30 = scalar_lea.vmem %s5317_s8, 4096  ;;  %s4909_s20 = smov [#allocation5]  }
 0x142   : > { %p4757_p0 = scmp.ne.s32.totalorder %s5317_s8, %s4756_s30  ;;  %s4761_s11 = sshll.u32 %s4909_s20, 4  ;;  %s4762_s11 = int_to_ptr.vmem [resolvable:$false] %s4761_s11 }
 0x143   : > { %s4763_s0 = scalar_lea.vmem %s4762_s11, 8192  ;;  %p4764_p11 = scmp.lt.s32.totalorder %s5317_s8, %s4762_s11 }
 0x144   : > { %p4759_p2 = pnand %p4757_p0, %p4713_p8  ;;  %p4765_p5 = scmp.lt.s32.totalorder %s4763_s0, %s4756_s30 }
 0x146   : > { %p4760_p6 = pneg %p4759_p2  ;;  %p4766_p9 = por %p4765_p5, %p4764_p11 }
 0x148   : > { %p4767_p10 = pnand %p4766_p9, %p4760_p6 }
 0x14a   : > { %4770 = shalt.err (!%p4767_p10)
}
 0x14b   : > { %4226 = dma.hbm_to_vmem [thread:$0]  (!%p5273_p12), %s5282_s29, 4096, %s5317_s8, %s5319_s19, %s6291_s18, %s6291_s18, %s6301_s4  }
 0x14c   : > { %s6302_s16 = sld [smem:[#allocation32_spill]] }
 0x152   : > { %p6303_p8 = scmp.ne.s32.totalorder %s6302_s16, 0 }
 0x153   : > { %s5351_s6 = sand.u32 (!%p6303_p8), 1, %s4885_s22  }
 0x154   : > { %507 = sbr.rel (%p6303_p8) target bundleno = 966 (0x3c6), region = 64  ;;  %s5354_s1 = sshll.u32 (!%p6303_p8), %s5351_s6, 8 }
 0x155   : > { %s510_s13 = scalar_lea.sflag (!%p6303_p8), [#allocation3], %s5351_s6  ;;  %s5358_s28 = scalar_lea.vmem (!%p6303_p8), [#allocation2], %s5354_s1 }
 0x15b   : > { %4844 = dma.done.wait (%p5250_p7), %s510_s13, 4096  }
 0x15c   : > { %4846 = vsyncadd (%p5250_p7), %s510_s13, 4294963200  ;;  %s518_s18 = sand.u32 1, %s5002_s27   ;;  %s5366_s4 = scalar_lea.vmem [#allocation5], %s5354_s1 }
 0x15d   : > { %s519_s29 = scalar_lea.sflag [#allocation6], %s518_s18 }
 0x15e   : > { %4848 = dma.done.wait (%p5250_p7), %s519_s29, 4096  }
 0x15f   : > { %4850 = vsyncadd (%p5250_p7), %s519_s29, 4294963200  ;;  %p6304_p12 = scmp.eq.s32.totalorder %s5002_s27, 0 }
 0x161   : > { %4852 = dma.done.wait (%p6304_p12), [#allocation6], 16   ;;  %p6305_p3 = pmov %p6304_p12 }
 0x163   : > { %4854 = vsyncadd (%p6305_p3), [#allocation6], 4294967280  ;;  %p6306_p4 = pmov %p6305_p3 }
 0x164   : > { %p6307_p1 = pmov %p6305_p3 }
 0x165   : > { %4856 = dma.done.wait (%p6306_p4), [#allocation9], 144  }
 0x166   : > { %4858 = vsyncadd (%p6307_p1), [#allocation9], 4294967152  ;;  %p6308_p13 = pmov %p6307_p1 }
 0x167   : > { %p6309_p0 = pmov %p6307_p1 }
 0x168   : > { %4860 = dma.done.wait (%p6308_p13), [#allocation12], 384  }
 0x169   : > { %4862 = vsyncadd (%p6309_p0), [#allocation12], 4294966912  ;;  %p6310_p7 = pmov %p6309_p0 }
 0x16a   : > { %p6311_p2 = pmov %p6309_p0 }
 0x16b   : > { %4864 = dma.done.wait (%p6310_p7), [#allocation15], 1280  }
 0x16c   : > { %4866 = vsyncadd (%p6311_p2), [#allocation15], 4294966016  ;;  %p6312_p6 = pmov %p6309_p0 }
 0x16d   : > { %p6313_p11 = pmov %p6309_p0 }
 0x16e   : > { %4868 = dma.done.wait (%p6312_p6), [#allocation18], 2048  }
 0x16f   : > { %4870 = vsyncadd (%p6313_p11), [#allocation18], 4294965248  ;;  %v4910_v0 = vmov 0.0   ;;  %vm4911_vm0 = vmmov 0   ;;  %v5398_v1 = vld [vmem:[#allocation7] ss:$0 sm:$0xff] }
 0x170   : > { %3764 = vmatprep.subr.bf16.mxu0 %v4910_v0  ;;  %3770 = vmatprep.subr.bf16.mxu1 %v4910_v0  ;;  %v5400_v2 = vld [vmem:[#allocation8] ss:$0 sm:$0xff]  ;;  %v613_v4 = vld [vmem:[%s5358_s28 + $0x8] sm:$0xff]  ;;  %v614_v6 = vld [vmem:[%s5358_s28 + $0x10] sm:$0xff]  ;;  %vm1177_vm1 = vcmask 130048   ;;  %s6055_s26 = scalar_lea.vmem [#allocation20], %s5354_s1 }
 0x171   : > { %3766 = vmatprep.mubr.msk.bf16.mxu0 %vm4911_vm0, %v4910_v0  ;;  %3772 = vmatprep.mubr.msk.bf16.mxu1 %vm4911_vm0, %v4910_v0  ;;  %v612_v3 = vld [vmem:[%s5358_s28] sm:$0xff]  ;;  %v615_v7 = vld [vmem:[%s5358_s28 + $0x18] sm:$0xff]  ;;  %v651_v8 = vmul.f32 %v5398_v1, %v613_v4  ;;  %v652_v9 = vmul.f32 %v5398_v1, %v614_v6  ;;  %v617_v13 = vld [vmem:[%s5358_s28 + $0x28] sm:$0xff]  ;;  %s6092_s8 = scalar_lea.vmem [#allocation21], %s5354_s1  ;;  %s3626_s19 = sshll.u32 %s5002_s27, 12 }
 0x172   : > { %v650_v5 = vmul.f32 %v5398_v1, %v612_v3  ;;  %v653_v10 = vmul.f32 %v5398_v1, %v615_v7  ;;  %v616_v12 = vld [vmem:[%s5358_s28 + $0x20] sm:$0xff]  ;;  %v618_v14 = vld [vmem:[%s5358_s28 + $0x30] sm:$0xff]  ;;  %v655_v20 = vmul.f32 %v5398_v1, %v617_v13  ;;  %v619_v21 = vld [vmem:[%s5358_s28 + $0x38] sm:$0xff]  ;;  %s3295_s14 = sshll.u32 %s6055_s26, 4  ;;  %s6314_s7 = sld [smem:[#allocation42_spill]]  ;;  %s6139_s14 = int_to_ptr.vmem [resolvable:$true] %s3295_s14 }
 0x173   : > { %v689_v15 = vadd.f32 %v5400_v2, %v651_v8  ;;  %v690_v16 = vadd.f32 %v5400_v2, %v652_v9  ;;  %v654_v18 = vmul.f32 %v5398_v1, %v616_v12  ;;  %v656_v22 = vmul.f32 %v5398_v1, %v618_v14  ;;  %v620_v24 = vld [vmem:[%s5358_s28 + $0x40] sm:$0xff]  ;;  %v621_v31 = vld [vmem:[%s5358_s28 + $0x48] sm:$0xff]  ;;  %v622_v38 = vld [vmem:[%s5358_s28 + $0x50] sm:$0xff]  ;;  %s3277_s20 = scalar_lea.sflag [#allocation4], %s5351_s6  ;;  %s4771_s11 = scalar_lea.vmem %s6139_s14, 4096 }
 0x174   : > { %v688_v11 = vadd.f32 %v5400_v2, %v650_v5  ;;  %v691_v17 = vadd.f32 %v5400_v2, %v653_v10  ;;  %v693_v28 = vadd.f32 %v5400_v2, %v655_v20  ;;  %v657_v29 = vmul.f32 %v5398_v1, %v619_v21  ;;  %v623_v39 = vld [vmem:[%s5358_s28 + $0x58] sm:$0xff]  ;;  %v624_v43 = vld [vmem:[%s5358_s28 + $0x60] sm:$0xff]  ;;  %v625_v50 = vld [vmem:[%s5358_s28 + $0x68] sm:$0xff]  ;;  %p4772_p5 = scmp.ne.s32.totalorder %s6139_s14, %s4771_s11  ;;  %p6315_p9 = scmp.ne.s32.totalorder %s6296_s12, 0 }
 0x175   : > { %v753_v23 = vmul.f32 0.70710677, %v689_v15  ;;  %v754_v25 = vmul.f32 0.70710677, %v690_v16  ;;  %v692_v27 = vadd.f32 %v5400_v2, %v654_v18  ;;  %v694_v30 = vadd.f32 %v5400_v2, %v656_v22  ;;  %v626_v58 = vld [vmem:[%s5358_s28 + $0x70] sm:$0xff]  ;;  %v627_v62 = vld [vmem:[%s5358_s28 + $0x78] sm:$0xff] }
 0x176   : > { %v752_v19 = vmul.f32 0.70710677, %v688_v11  ;;  %v755_v26 = vmul.f32 0.70710677, %v691_v17  ;;  %v720_v32 = vmul.f32 0.5, %v688_v11  ;;  %v658_v34 = vmul.f32 %v5398_v1, %v620_v24  ;;  %p4773_p10 = pnand %p4772_p5, %p6315_p9  ;;  %s4912_s0 = smov [#allocation20]  }
 0x177   : > { %v756_v33 = vmul.f32 0.70710677, %v692_v27  ;;  %v721_v35 = vmul.f32 0.5, %v689_v15  ;;  %v757_v36 = vmul.f32 0.70710677, %v693_v28  ;;  %v695_v37 = vadd.f32 %v5400_v2, %v657_v29  ;;  %s4775_s16 = sshll.u32 %s4912_s0, 4  ;;  %s4776_s16 = int_to_ptr.vmem [resolvable:$false] %s4775_s16 }
 0x178   : > { %4329 = verf.f32 %v752_v19  ;;  %v722_v40 = vmul.f32 0.5, %v690_v16  ;;  %v758_v41 = vmul.f32 0.70710677, %v694_v30  ;;  %v659_v42 = vmul.f32 %v5398_v1, %v621_v31  ;;  %s6137_s30 = scalar_lea.hbm %s6314_s7, %s3626_s19  ;;  %p4774_p8 = pneg %p4773_p10 }
 0x179   : > { %4331 = verf.f32 %v753_v23  ;;  %v723_v44 = vmul.f32 0.5, %v691_v17  ;;  %v759_v45 = vmul.f32 0.70710677, %v695_v37  ;;  %v696_v46 = vadd.f32 %v5400_v2, %v658_v34  ;;  %s4777_s1 = scalar_lea.vmem %s4776_s16, 8192  ;;  %p4778_p12 = scmp.lt.s32.totalorder %s6139_s14, %s4776_s16 }
 0x17a   : > { %4333 = verf.f32 %v754_v25  ;;  %v697_v47 = vadd.f32 %v5400_v2, %v659_v42  ;;  %v660_v48 = vmul.f32 %v5398_v1, %v622_v38  ;;  %v661_v49 = vmul.f32 %v5398_v1, %v623_v39  ;;  %p4779_p3 = scmp.lt.s32.totalorder %s4777_s1, %s4771_s11 }
 0x17b   : > { %4335 = verf.f32 %v755_v26  ;;  %v724_v51 = vmul.f32 0.5, %v692_v27  ;;  %v760_v52 = vmul.f32 0.70710677, %v696_v46  ;;  %v662_v53 = vmul.f32 %v5398_v1, %v624_v43 }
 0x17c   : > { %4337 = verf.f32 %v756_v33  ;;  %v725_v54 = vmul.f32 0.5, %v693_v28  ;;  %v761_v55 = vmul.f32 0.70710677, %v697_v47  ;;  %v698_v56 = vadd.f32 %v5400_v2, %v660_v48  ;;  %v629_v33 = vld [vmem:[%s5358_s28 + $0x88] sm:$0xff]  ;;  %p4780_p4 = por %p4779_p3, %p4778_p12 }
 0x17d   : > { %4339 = verf.f32 %v757_v36  ;;  %v699_v57 = vadd.f32 %v5400_v2, %v661_v49  ;;  %v726_v59 = vmul.f32 0.5, %v694_v30  ;;  %v663_v60 = vmul.f32 %v5398_v1, %v625_v50 }
 0x17e   : > { %4341 = verf.f32 %v758_v41  ;;  %v5444_v61 = vadd.f32 %v5400_v2, %v662_v53  ;;  %v727_v3 = vmul.f32 0.5, %v695_v37  ;;  %v5447_v4 = vmul.f32 0.5, %v696_v46  ;;  %p4781_p1 = pnand %p4780_p4, %p4774_p8 }
 0x17f   : > { %4343 = verf.f32 %v759_v45  ;;  %v762_v5 = vmul.f32 0.70710677, %v698_v56  ;;  %v763_v8 = vmul.f32 0.70710677, %v699_v57  ;;  %v5450_v9 = vadd.f32 %v5400_v2, %v663_v60 }
 0x180   : > { %4345 = verf.f32 %v760_v52  ;;  %v664_v10 = vmul.f32 %v5398_v1, %v626_v58  ;;  %v764_v13 = vmul.f32 0.70710677, %v5444_v61  ;;  %v665_v14 = vmul.f32 %v5398_v1, %v627_v62 }
 0x181   : > { %4347 = verf.f32 %v761_v55  ;;  %v729_v18 = vmul.f32 0.5, %v697_v47  ;;  %v765_v22 = vmul.f32 0.70710677, %v5450_v9  ;;  %v730_v38 = vmul.f32 0.5, %v698_v56 }
 0x182   : > { %v4330_v63 = vpop.eup %4329  ;;  %4349 = verf.f32 %v762_v5  ;;  %v702_v26 = vadd.f32 %v5400_v2, %v664_v10  ;;  %v5458_v27 = vadd.f32 %v5400_v2, %v665_v14  ;;  %v731_v39 = vmul.f32 0.5, %v699_v57  ;;  %v631_v57 = vld [vmem:[%s5358_s28 + $0x98] sm:$0xff]  ;;  %v632_v10 = vld [vmem:[%s5358_s28 + $0xa0] sm:$0xff]  ;;  %v633_v14 = vld [vmem:[%s5358_s28 + $0xa8] sm:$0xff] }
 0x183   : > { %v4332_v6 = vpop.eup %4331  ;;  %v816_v7 = vadd.f32 1.0, %v4330_v63  ;;  %4351 = verf.f32 %v763_v8  ;;  %v667_v49 = vmul.f32 %v5398_v1, %v629_v33  ;;  %v732_v62 = vmul.f32 0.5, %v5444_v61  ;;  %v637_v33 = vld [vmem:[%s5358_s28 + $0xc8] sm:$0xff] }
 0x184   : > { %v4334_v11 = vpop.eup %4333  ;;  %v817_v12 = vadd.f32 1.0, %v4332_v6  ;;  %4353 = verf.f32 %v764_v13  ;;  %v766_v43 = vmul.f32 0.70710677, %v702_v26  ;;  %v767_v47 = vmul.f32 0.70710677, %v5458_v27 }
 0x185   : > { %v4336_v15 = vpop.eup %4335  ;;  %v848_v16 = vmul.f32 %v816_v7, %v720_v32  ;;  %v818_v17 = vadd.f32 1.0, %v4334_v11  ;;  %4355 = verf.f32 %v765_v22  ;;  %v628_v32 = vld [vmem:[%s5358_s28 + $0x80] sm:$0xff]  ;;  %v5482_v56 = vadd.f32 %v5400_v2, %v667_v49 }
 0x186   : > { %v4338_v19 = vpop.eup %4337  ;;  %v849_v20 = vmul.f32 %v817_v12, %v721_v35  ;;  %v819_v21 = vadd.f32 1.0, %v4336_v15  ;;  %v5464_v35 = vld [vmem:[#allocation10] sm:$0xff]   ;;  %v666_v48 = vmul.f32 %v5398_v1, %v628_v32  ;;  %4357 = verf.f32 %v766_v43  ;;  %v634_v15 = vld [vmem:[%s5358_s28 + $0xb0] sm:$0xff] }
 0x187   : > { %v4340_v23 = vpop.eup %4339  ;;  %v850_v24 = vmul.f32 %v818_v17, %v722_v40  ;;  %v820_v25 = vadd.f32 1.0, %v4338_v19  ;;  %4359 = verf.f32 %v767_v47  ;;  %v733_v7 = vmul.f32 0.5, %v5450_v9  ;;  %v635_v19 = vld [vmem:[%s5358_s28 + $0xb8] sm:$0xff] }
 0x188   : > { %v4342_v28 = vpop.eup %4341  ;;  %v5460_v29 = vpack.c.bf16 %v849_v20, %v848_v16  ;;  %v851_v30 = vmul.f32 %v819_v21, %v723_v44  ;;  %v821_v31 = vadd.f32 1.0, %v4340_v23  ;;  %v630_v44 = vld [vmem:[%s5358_s28 + $0x90] sm:$0xff]  ;;  %v704_v55 = vadd.f32 %v5400_v2, %v666_v48 }
 0x189   : > { %v4344_v34 = vpop.eup %4343  ;;  %v852_v36 = vmul.f32 %v820_v25, %v724_v51  ;;  %v822_v37 = vadd.f32 1.0, %v4342_v28  ;;  %v668_v63 = vmul.f32 %v5398_v1, %v630_v44  ;;  %v734_v8 = vmul.f32 0.5, %v702_v26 }
 0x18a   : > { %3765 = vmatpush3.bf16.msra.mxu0 %v5460_v29  ;;  %v5467_v40 = vpack.c.bf16 %v851_v30, %v850_v24  ;;  %v853_v41 = vmul.f32 %v821_v31, %v725_v54  ;;  %v823_v42 = vadd.f32 1.0, %v4344_v34  ;;  %v4346_v45 = vpop.eup %4345  ;;  %v768_v11 = vmul.f32 0.70710677, %v704_v55  ;;  %v636_v24 = vld [vmem:[%s5358_s28 + $0xc0] sm:$0xff] }
 0x18b   : > { %3776 = vmatprep.subr.bf16.mxu0 %v4910_v0  ;;  %v854_v46 = vmul.f32 %v822_v37, %v726_v59  ;;  %v4348_v50 = vpop.eup %4347  ;;  %v824_v53 = vadd.f32 1.0, %v4346_v45  ;;  %v769_v12 = vmul.f32 0.70710677, %v5482_v56  ;;  %v669_v13 = vmul.f32 %v5398_v1, %v631_v57 }
 0x18c   : > { %3771 = vmatpush3.bf16.msra.mxu1 %v5467_v40  ;;  %v5475_v51 = vpack.c.bf16 %v853_v41, %v852_v36  ;;  %v855_v52 = vmul.f32 %v823_v42, %v727_v3  ;;  %v825_v54 = vadd.f32 1.0, %v4348_v50  ;;  %v4350_v58 = vpop.eup %4349  ;;  %4361 = verf.f32 %v768_v11 }
 0x18d   : > { %3767 = vmatmul.mubr.msk.bf16.vlgmr.msra.gmra.mrb[0].mxu0 %vm1177_vm1, %v5464_v35  ;;  %3782 = vmatprep.subr.bf16.mxu1 %v4910_v0  ;;  %v856_v60 = vmul.f32 %v824_v53, %v5447_v4  ;;  %v4352_v3 = vpop.eup %4351  ;;  %v826_v6 = vadd.f32 1.0, %v4350_v58  ;;  %v707_v22 = vadd.f32 %v5400_v2, %v669_v13  ;;  %v670_v23 = vmul.f32 %v5398_v1, %v632_v10 }
 0x18e   : > { %3777 = vmatpush3.bf16.msra.mxu0 %v5475_v51  ;;  %v5486_v59 = vpack.c.bf16 %v855_v52, %v854_v46  ;;  %3778 = vmatprep.mubr.msk.bf16.mxu0 %vm4911_vm0, %v4910_v0  ;;  %v857_v5 = vmul.f32 %v825_v54, %v729_v18  ;;  %v4354_v4 = vpop.eup %4353  ;;  %v827_v61 = vadd.f32 1.0, %v4352_v3  ;;  %v706_v18 = vadd.f32 %v5400_v2, %v668_v63  ;;  %v640_v63 = vld [vmem:[%s5358_s28 + $0xe0] sm:$0xff] }
 0x18f   : > { %3773 = vmatmul.mubr.msk.bf16.vlgmr.msra.gmra.mrb[0].mxu1 %vm1177_vm1, %v5464_v35  ;;  %3788 = vmatprep.subr.bf16.mxu0 %v4910_v0  ;;  %v858_v9 = vmul.f32 %v826_v6, %v730_v38  ;;  %v828_v17 = vadd.f32 1.0, %v4354_v4  ;;  %v4356_v20 = vpop.eup %4355  ;;  %v735_v26 = vmul.f32 0.5, %v5458_v27  ;;  %4363 = verf.f32 %v769_v12 }
 0x190   : > { %3783 = vmatpush3.bf16.msra.mxu1 %v5486_v59  ;;  %3784 = vmatprep.mubr.msk.bf16.mxu1 %vm4911_vm0, %v4910_v0  ;;  %v5505_v16 = vpack.c.bf16 %v857_v5, %v856_v60  ;;  %v859_v21 = vmul.f32 %v827_v61, %v731_v39  ;;  %v829_v25 = vadd.f32 1.0, %v4356_v20  ;;  %v5516_v30 = vmul.f32 0.5, %v704_v55  ;;  %v4358_v38 = vpop.eup %4357  ;;  %v638_v55 = vld [vmem:[%s5358_s28 + $0xd0] sm:$0xff] }
 0x191   : > { %3794 = vmatprep.subr.bf16.mxu1 %v4910_v0  ;;  %v770_v31 = vmul.f32 0.70710677, %v706_v18  ;;  %v771_v32 = vmul.f32 0.70710677, %v707_v22  ;;  %v671_v34 = vmul.f32 %v5398_v1, %v633_v14  ;;  %v708_v36 = vadd.f32 %v5400_v2, %v670_v23  ;;  %v4360_v42 = vpop.eup %4359 }
 0x192   : > { %v5514_v28 = vpack.c.bf16 %v859_v21, %v858_v9  ;;  %v672_v37 = vmul.f32 %v5398_v1, %v634_v15  ;;  %v860_v27 = vmul.f32 %v828_v17, %v732_v62  ;;  %v861_v39 = vmul.f32 %v829_v25, %v733_v7  ;;  %v639_v62 = vld [vmem:[%s5358_s28 + $0xd8] sm:$0xff]  ;;  %v641_v7 = vld [vmem:[%s5358_s28 + $0xe8] sm:$0xff]  ;;  %v642_v21 = vld [vmem:[%s5358_s28 + $0xf0] sm:$0xff] }
 0x193   : > { %4365 = verf.f32 %v770_v31  ;;  %v673_v41 = vmul.f32 %v5398_v1, %v635_v19  ;;  %v830_v43 = vadd.f32 1.0, %v4358_v38  ;;  %v709_v44 = vadd.f32 %v5400_v2, %v671_v34 }
 0x194   : > { %4367 = verf.f32 %v771_v32  ;;  %v674_v45 = vmul.f32 %v5398_v1, %v636_v24  ;;  %v831_v46 = vadd.f32 1.0, %v4360_v42  ;;  %v772_v47 = vmul.f32 0.70710677, %v708_v36 }
 0x195   : > { %3779 = vmatmul.mubr.msk.bf16.vlgmr.msra.gmra.mrb[4].mxu0 %vm1177_vm1, %v5464_v35  ;;  %v710_v48 = vadd.f32 %v5400_v2, %v672_v37  ;;  %v675_v49 = vmul.f32 %v5398_v1, %v637_v33  ;;  %v862_v50 = vmul.f32 %v830_v43, %v734_v8  ;;  %v737_v52 = vmul.f32 0.5, %v5482_v56 }
 0x196   : > { %3789 = vmatpush3.bf16.msra.mxu0 %v5505_v16  ;;  %3790 = vmatprep.mubr.msk.bf16.mxu0 %vm4911_vm0, %v4910_v0  ;;  %v773_v53 = vmul.f32 0.70710677, %v709_v44  ;;  %v711_v54 = vadd.f32 %v5400_v2, %v673_v41  ;;  %v5542_v57 = vpack.c.bf16 %v861_v39, %v860_v27  ;;  %v863_v58 = vmul.f32 %v831_v46, %v735_v26  ;;  %v4362_v8 = vpop.eup %4361  ;;  %v643_v26 = vld [vmem:[%s5358_s28 + $0xf8] sm:$0xff] }
 0x197   : > { %3785 = vmatmul.mubr.msk.bf16.vlgmr.msra.gmra.mrb[4].mxu1 %vm1177_vm1, %v5464_v35  ;;  %3800 = vmatprep.subr.bf16.mxu0 %v4910_v0  ;;  %4369 = verf.f32 %v772_v47  ;;  %v774_v60 = vmul.f32 0.70710677, %v710_v48  ;;  %v738_v3 = vmul.f32 0.5, %v706_v18  ;;  %v712_v6 = vadd.f32 %v5400_v2, %v674_v45 }
 0x198   : > { %3795 = vmatpush3.bf16.msra.mxu1 %v5514_v28  ;;  %3796 = vmatprep.mubr.msk.bf16.mxu1 %vm4911_vm0, %v4910_v0  ;;  %4371 = verf.f32 %v773_v53  ;;  %v775_v5 = vmul.f32 0.70710677, %v711_v54  ;;  %v5548_v10 = vpack.c.bf16 %v863_v58, %v862_v50  ;;  %v5551_v56 = vadd.f32 %v5400_v2, %v675_v49 }
 0x199   : > { %3806 = vmatprep.subr.bf16.mxu1 %v4910_v0  ;;  %4373 = verf.f32 %v774_v60  ;;  %v676_v4 = vmul.f32 %v5398_v1, %v638_v55  ;;  %v4364_v61 = vpop.eup %4363  ;;  %v832_v11 = vadd.f32 1.0, %v4362_v8  ;;  %v739_v12 = vmul.f32 0.5, %v707_v22  ;;  %v880_v60 = vld [vmem:[%s5366_s4] sm:$0xff] }
 0x19a   : > { %4375 = verf.f32 %v775_v5  ;;  %v776_v13 = vmul.f32 0.70710677, %v712_v6  ;;  %v833_v14 = vadd.f32 1.0, %v4364_v61  ;;  %v740_v15 = vmul.f32 0.5, %v708_v36  ;;  %v881_v61 = vld [vmem:[%s5366_s4 + $0x8] sm:$0xff] }
 0x19b   : > { %v777_v9 = vmul.f32 0.70710677, %v5551_v56  ;;  %v677_v17 = vmul.f32 %v5398_v1, %v639_v62  ;;  %v864_v18 = vmul.f32 %v832_v11, %v5516_v30  ;;  %v714_v19 = vadd.f32 %v5400_v2, %v676_v4 }
 0x19c   : > { %4377 = verf.f32 %v776_v13  ;;  %v678_v20 = vmul.f32 %v5398_v1, %v640_v63  ;;  %v865_v23 = vmul.f32 %v833_v14, %v737_v52  ;;  %v679_v25 = vmul.f32 %v5398_v1, %v641_v7 }
 0x19d   : > { %3791 = vmatmul.mubr.msk.bf16.vlgmr.msra.gmra.mrb[8].mxu0 %vm1177_vm1, %v5464_v35  ;;  %v4366_v22 = vpop.eup %4365  ;;  %4379 = verf.f32 %v777_v9  ;;  %v5572_v24 = vadd.f32 %v5400_v2, %v677_v17  ;;  %v741_v32 = vmul.f32 0.5, %v709_v44  ;;  %v778_v33 = vmul.f32 0.70710677, %v714_v19  ;;  %v882_v9 = vld [vmem:[%s5366_s4 + $0x10] sm:$0xff]  ;;  %v883_v17 = vld [vmem:[%s5366_s4 + $0x18] sm:$0xff] }
 0x19e   : > { %3801 = vmatpush3.bf16.msra.mxu0 %v5542_v57  ;;  %3802 = vmatprep.mubr.msk.bf16.mxu0 %vm4911_vm0, %v4910_v0  ;;  %v4368_v30 = vpop.eup %4367  ;;  %v834_v31 = vadd.f32 1.0, %v4366_v22  ;;  %v5578_v34 = vadd.f32 %v5400_v2, %v678_v20  ;;  %v5580_v36 = vpack.c.bf16 %v865_v23, %v864_v18  ;;  %v742_v38 = vmul.f32 0.5, %v710_v48 }
 0x19f   : > { %3797 = vmatmul.mubr.msk.bf16.vlgmr.msra.gmra.mrb[8].mxu1 %vm1177_vm1, %v5464_v35  ;;  %3812 = vmatprep.subr.bf16.mxu0 %v4910_v0  ;;  %v835_v37 = vadd.f32 1.0, %v4368_v30  ;;  %v779_v27 = vmul.f32 0.70710677, %v5572_v24  ;;  %v743_v41 = vmul.f32 0.5, %v711_v54  ;;  %4381 = verf.f32 %v778_v33 }
 0x1a0   : > { %3807 = vmatpush3.bf16.msra.mxu1 %v5548_v10  ;;  %3808 = vmatprep.mubr.msk.bf16.mxu1 %vm4911_vm0, %v4910_v0  ;;  %v866_v39 = vmul.f32 %v834_v31, %v738_v3  ;;  %v5584_v42 = vadd.f32 %v5400_v2, %v679_v25  ;;  %v780_v44 = vmul.f32 0.70710677, %v5578_v34  ;;  %v680_v46 = vmul.f32 %v5398_v1, %v642_v21 }
 0x1a1   : > { %3818 = vmatprep.subr.bf16.mxu1 %v4910_v0  ;;  %v4370_v43 = vpop.eup %4369  ;;  %v867_v45 = vmul.f32 %v835_v37, %v739_v12  ;;  %4383 = verf.f32 %v779_v27  ;;  %v744_v49 = vmul.f32 0.5, %v712_v6  ;;  %v681_v52 = vmul.f32 %v5398_v1, %v643_v26  ;;  %v884_v26 = vld [vmem:[%s5366_s4 + $0x20] sm:$0xff] }
 0x1a2   : > { %v4372_v47 = vpop.eup %4371  ;;  %v836_v48 = vadd.f32 1.0, %v4370_v43  ;;  %v781_v50 = vmul.f32 0.70710677, %v5584_v42  ;;  %4385 = verf.f32 %v780_v44  ;;  %v5598_v58 = vadd.f32 %v5400_v2, %v680_v46 }
 0x1a3   : > { %v4374_v53 = vpop.eup %4373  ;;  %v5593_v54 = vpack.c.bf16 %v867_v45, %v866_v39  ;;  %v837_v55 = vadd.f32 1.0, %v4372_v47  ;;  %v5605_v5 = vadd.f32 %v5400_v2, %v681_v52  ;;  %v745_v8 = vmul.f32 0.5, %v5551_v56 }
 0x1a4   : > { %v4376_v62 = vpop.eup %4375  ;;  %v868_v63 = vmul.f32 %v836_v48, %v740_v15  ;;  %v838_v3 = vadd.f32 1.0, %v4374_v53  ;;  %4387 = verf.f32 %v781_v50  ;;  %v782_v4 = vmul.f32 0.70710677, %v5598_v58 }
 0x1a5   : > { %3803 = vmatmul.mubr.msk.bf16.vlgmr.msra.gmra.mrb[12].mxu0 %vm1177_vm1, %v5464_v35  ;;  %v869_v6 = vmul.f32 %v837_v55, %v741_v32  ;;  %v839_v7 = vadd.f32 1.0, %v4376_v62  ;;  %v746_v13 = vmul.f32 0.5, %v714_v19  ;;  %v783_v14 = vmul.f32 0.70710677, %v5605_v5 }
 0x1a6   : > { %3813 = vmatpush3.bf16.msra.mxu0 %v5580_v36  ;;  %3814 = vmatprep.mubr.msk.bf16.mxu0 %vm4911_vm0, %v4910_v0  ;;  %v4378_v11 = vpop.eup %4377  ;;  %v870_v12 = vmul.f32 %v838_v3, %v742_v38  ;;  %v912_v15 = vmul.f32 %v5398_v1, %v880_v60  ;;  %4389 = verf.f32 %v782_v4  ;;  %v913_v23 = vmul.f32 %v5398_v1, %v881_v61  ;;  %v886_v60 = vld [vmem:[%s5366_s4 + $0x30] sm:$0xff]  ;;  %v887_v61 = vld [vmem:[%s5366_s4 + $0x38] sm:$0xff] }
 0x1a7   : > { %3809 = vmatmul.mubr.msk.bf16.vlgmr.msra.gmra.mrb[12].mxu1 %vm1177_vm1, %v5464_v35  ;;  %3824 = vmatprep.subr.bf16.mxu0 %v4910_v0  ;;  %v4380_v18 = vpop.eup %4379  ;;  %v5618_v20 = vpack.c.bf16 %v869_v6, %v868_v63  ;;  %v871_v21 = vmul.f32 %v839_v7, %v743_v41  ;;  %v840_v56 = vadd.f32 1.0, %v4378_v11  ;;  %4391 = verf.f32 %v783_v14 }
 0x1a8   : > { %3819 = vmatpush3.bf16.msra.mxu1 %v5593_v54  ;;  %3820 = vmatprep.mubr.msk.bf16.mxu1 %vm4911_vm0, %v4910_v0  ;;  %v841_v22 = vadd.f32 1.0, %v4380_v18  ;;  %v944_v25 = vadd.f32 %v5400_v2, %v912_v15  ;;  %v914_v31 = vmul.f32 %v5398_v1, %v882_v9  ;;  %v915_v32 = vmul.f32 %v5398_v1, %v883_v17 }
 0x1a9   : > { %3830 = vmatprep.subr.bf16.mxu1 %v4910_v0  ;;  %v5623_v19 = vpack.c.bf16 %v871_v21, %v870_v12  ;;  %v872_v30 = vmul.f32 %v840_v56, %v744_v49  ;;  %v4382_v33 = vpop.eup %4381  ;;  %v747_v38 = vmul.f32 0.5, %v5572_v24  ;;  %v945_v27 = vadd.f32 %v5400_v2, %v913_v23  ;;  %v885_v49 = vld [vmem:[%s5366_s4 + $0x28] sm:$0xff]  ;;  %v888_v56 = vld [vmem:[%s5366_s4 + $0x40] sm:$0xff] }
 0x1aa   : > { %v873_v37 = vmul.f32 %v841_v22, %v745_v8  ;;  %v1008_v39 = vmul.f32 0.70710677, %v944_v25  ;;  %v842_v43 = vadd.f32 1.0, %v4382_v33  ;;  %v5635_v45 = vadd.f32 %v5400_v2, %v914_v31  ;;  %v890_v31 = vld [vmem:[%s5366_s4 + $0x50] sm:$0xff] }
 0x1ab   : > { %v4384_v41 = vpop.eup %4383  ;;  %v5638_v44 = vadd.f32 %v5400_v2, %v915_v32  ;;  %v916_v46 = vmul.f32 %v5398_v1, %v884_v26  ;;  %v748_v47 = vmul.f32 0.5, %v5578_v34  ;;  %v1009_v48 = vmul.f32 0.70710677, %v945_v27 }
 0x1ac   : > { %v843_v24 = vadd.f32 1.0, %v4384_v41  ;;  %v4386_v50 = vpop.eup %4385  ;;  %v5649_v52 = vpack.c.bf16 %v873_v37, %v872_v30  ;;  %v874_v53 = vmul.f32 %v842_v43, %v746_v13  ;;  %v749_v55 = vmul.f32 0.5, %v5584_v42  ;;  %v889_v30 = vld [vmem:[%s5366_s4 + $0x48] sm:$0xff] }
 0x1ad   : > { %3815 = vmatmul.mubr.msk.bf16.vlgmr.msra.gmra.mrb[16].mxu0 %vm1177_vm1, %v5464_v35  ;;  %4393 = verf.f32 %v1008_v39  ;;  %v844_v63 = vadd.f32 1.0, %v4386_v50  ;;  %v1010_v3 = vmul.f32 0.70710677, %v5635_v45  ;;  %v1011_v7 = vmul.f32 0.70710677, %v5638_v44 }
 0x1ae   : > { %3825 = vmatpush3.bf16.msra.mxu0 %v5618_v20  ;;  %3826 = vmatprep.mubr.msk.bf16.mxu0 %vm4911_vm0, %v4910_v0  ;;  %v4388_v62 = vpop.eup %4387  ;;  %v875_v34 = vmul.f32 %v843_v24, %v747_v38  ;;  %4395 = verf.f32 %v1009_v48  ;;  %v917_v8 = vmul.f32 %v5398_v1, %v885_v49  ;;  %v5658_v4 = vadd.f32 %v5400_v2, %v916_v46  ;;  %v891_v38 = vld [vmem:[%s5366_s4 + $0x58] sm:$0xff] }
 0x1af   : > { %3821 = vmatmul.mubr.msk.bf16.vlgmr.msra.gmra.mrb[16].mxu1 %vm1177_vm1, %v5464_v35  ;;  %3836 = vmatprep.subr.bf16.mxu0 %v4910_v0  ;;  %v845_v6 = vadd.f32 1.0, %v4388_v62  ;;  %v750_v42 = vmul.f32 0.5, %v5598_v58  ;;  %v751_v11 = vmul.f32 0.5, %v5605_v5  ;;  %4397 = verf.f32 %v1010_v3 }
 0x1b0   : > { %3831 = vmatpush3.bf16.msra.mxu1 %v5623_v19  ;;  %3832 = vmatprep.mubr.msk.bf16.mxu1 %vm4911_vm0, %v4910_v0  ;;  %v918_v12 = vmul.f32 %v5398_v1, %v886_v60  ;;  %v4390_v13 = vpop.eup %4389  ;;  %v5664_v14 = vpack.c.bf16 %v875_v34, %v874_v53  ;;  %v976_v15 = vmul.f32 0.5, %v944_v25  ;;  %4399 = verf.f32 %v1011_v7 }
 0x1b1   : > { %3842 = vmatprep.subr.bf16.mxu1 %v4910_v0  ;;  %v5667_v9 = vadd.f32 %v5400_v2, %v917_v8  ;;  %v4392_v17 = vpop.eup %4391  ;;  %v846_v58 = vadd.f32 1.0, %v4390_v13  ;;  %v1012_v5 = vmul.f32 0.70710677, %v5658_v4  ;;  %v919_v18 = vmul.f32 %v5398_v1, %v887_v61 }
 0x1b2   : > { %v5674_v21 = vadd.f32 %v5400_v2, %v918_v12  ;;  %v876_v22 = vmul.f32 %v844_v63, %v748_v47  ;;  %v877_v23 = vmul.f32 %v845_v6, %v749_v55  ;;  %v847_v25 = vadd.f32 1.0, %v4392_v17 }
 0x1b3   : > { %v1013_v26 = vmul.f32 0.70710677, %v5667_v9  ;;  %v878_v32 = vmul.f32 %v846_v58, %v750_v42  ;;  %v977_v33 = vmul.f32 0.5, %v945_v27  ;;  %4401 = verf.f32 %v1012_v5  ;;  %v893_v5 = vld [vmem:[%s5366_s4 + $0x68] sm:$0xff] }
 0x1b4   : > { %v5687_v37 = vadd.f32 %v5400_v2, %v919_v18  ;;  %v879_v39 = vmul.f32 %v847_v25, %v751_v11  ;;  %v1014_v41 = vmul.f32 0.70710677, %v5674_v21  ;;  %v920_v43 = vmul.f32 %v5398_v1, %v888_v56  ;;  %v892_v11 = vld [vmem:[%s5366_s4 + $0x60] sm:$0xff]  ;;  %v894_v18 = vld [vmem:[%s5366_s4 + $0x70] sm:$0xff] }
 0x1b5   : > { %3827 = vmatmul.mubr.msk.bf16.vlgmr.msra.gmra.mrb[20].mxu0 %vm1177_vm1, %v5464_v35  ;;  %4403 = verf.f32 %v1013_v26  ;;  %v978_v27 = vmul.f32 0.5, %v5635_v45  ;;  %v921_v24 = vmul.f32 %v5398_v1, %v889_v30  ;;  %v922_v47 = vmul.f32 %v5398_v1, %v890_v31 }
 0x1b6   : > { %3837 = vmatpush3.bf16.msra.mxu0 %v5649_v52  ;;  %3838 = vmatprep.mubr.msk.bf16.mxu0 %vm4911_vm0, %v4910_v0  ;;  %v1015_v46 = vmul.f32 0.70710677, %v5687_v37  ;;  %v5700_v49 = vpack.c.bf16 %v877_v23, %v876_v22  ;;  %4405 = verf.f32 %v1014_v41  ;;  %v5703_v50 = vadd.f32 %v5400_v2, %v920_v43  ;;  %v895_v22 = vld [vmem:[%s5366_s4 + $0x78] sm:$0xff] }
 0x1b7   : > { %3833 = vmatmul.mubr.msk.bf16.vlgmr.msra.gmra.mrb[20].mxu1 %vm1177_vm1, %v5464_v35  ;;  %3848 = vmatprep.subr.bf16.mxu0 %v4910_v0  ;;  %v4394_v48 = vpop.eup %4393  ;;  %v923_v53 = vmul.f32 %v5398_v1, %v891_v38  ;;  %v953_v45 = vadd.f32 %v5400_v2, %v921_v24  ;;  %v5708_v62 = vadd.f32 %v5400_v2, %v922_v47  ;;  %v979_v61 = vmul.f32 0.5, %v5638_v44 }
 0x1b8   : > { %3843 = vmatpush3.bf16.msra.mxu1 %v5664_v14  ;;  %3844 = vmatprep.mubr.msk.bf16.mxu1 %vm4911_vm0, %v4910_v0  ;;  %v4396_v55 = vpop.eup %4395  ;;  %v1072_v60 = vadd.f32 1.0, %v4394_v48  ;;  %4407 = verf.f32 %v1015_v46  ;;  %v5710_v34 = vpack.c.bf16 %v879_v39, %v878_v32  ;;  %v1016_v3 = vmul.f32 0.70710677, %v5703_v50  ;;  %v5745_v46 = vld [vmem:[#allocation8] ss:$0 sm:$0xff] }
 0x1b9   : > { %3854 = vmatprep.subr.bf16.mxu1 %v4910_v0  ;;  %v1073_v63 = vadd.f32 1.0, %v4396_v55  ;;  %v5714_v6 = vadd.f32 %v5400_v2, %v923_v53  ;;  %v4398_v7 = vpop.eup %4397  ;;  %v1017_v42 = vmul.f32 0.70710677, %v953_v45  ;;  %v980_v58 = vmul.f32 0.5, %v5658_v4 }
 0x1ba   : > { %v1104_v8 = vmul.f32 %v1072_v60, %v976_v15  ;;  %v4400_v12 = vpop.eup %4399  ;;  %v1074_v17 = vadd.f32 1.0, %v4398_v7  ;;  %4409 = verf.f32 %v1016_v3  ;;  %v1018_v15 = vmul.f32 0.70710677, %v5708_v62 }
 0x1bb   : > { %v1105_v13 = vmul.f32 %v1073_v63, %v977_v33  ;;  %v1075_v44 = vadd.f32 1.0, %v4400_v12  ;;  %4411 = verf.f32 %v1017_v42  ;;  %v1019_v56 = vmul.f32 0.70710677, %v5714_v6  ;;  %v898_v12 = vld [vmem:[%s5366_s4 + $0x90] sm:$0xff] }
 0x1bc   : > { %v1106_v23 = vmul.f32 %v1074_v17, %v978_v27  ;;  %v981_v25 = vmul.f32 0.5, %v5667_v9  ;;  %v924_v26 = vmul.f32 %v5398_v1, %v892_v11  ;;  %4413 = verf.f32 %v1018_v15 }
 0x1bd   : > { %3839 = vmatmul.mubr.msk.bf16.vlgmr.msra.gmra.mrb[24].mxu0 %vm1177_vm1, %v5464_v35  ;;  %v1152_v4 = vpack.c.bf16 %v1105_v13, %v1104_v8  ;;  %v4402_v30 = vpop.eup %4401  ;;  %v1107_v31 = vmul.f32 %v1075_v44, %v979_v61  ;;  %v925_v32 = vmul.f32 %v5398_v1, %v893_v5  ;;  %v926_v33 = vmul.f32 %v5398_v1, %v894_v18  ;;  %v897_v61 = vld [vmem:[%s5366_s4 + $0x88] sm:$0xff]  ;;  %v899_v13 = vld [vmem:[%s5366_s4 + $0x98] sm:$0xff]  ;;  %v5776_v44 = vld [vmem:[#allocation7] ss:$0 sm:$0xff] }
 0x1be   : > { %3849 = vmatpush3.bf16.msra.mxu0 %v5700_v49  ;;  %3850 = vmatprep.mubr.msk.bf16.mxu0 %vm4911_vm0, %v4910_v0  ;;  %v1076_v39 = vadd.f32 1.0, %v4402_v30  ;;  %4415 = verf.f32 %v1019_v56  ;;  %v5741_v41 = vadd.f32 %v5400_v2, %v924_v26  ;;  %v927_v9 = vmul.f32 %v5398_v1, %v895_v22  ;;  %v5780_v22 = vld [vmem:[#allocation11] sm:$0xff]  }
 0x1bf   : > { %3845 = vmatmul.mubr.msk.bf16.vlgmr.msra.gmra.mrb[24].mxu1 %vm1177_vm1, %v5464_v35  ;;  %3860 = vmatprep.subr.bf16.mxu0 %v4910_v0  ;;  %v4404_v38 = vpop.eup %4403  ;;  %v982_v27 = vmul.f32 0.5, %v5674_v21  ;;  %v5748_v24 = vadd.f32 %v5745_v46, %v925_v32  ;;  %v5751_v47 = vadd.f32 %v5745_v46, %v926_v33  ;;  %v1153_v53 = vpack.c.bf16 %v1107_v31, %v1106_v23  ;;  %v896_v21 = vld [vmem:[%s5366_s4 + $0x80] sm:$0xff] }
 0x1c0   : > { %3855 = vmatpush3.bf16.msra.mxu1 %v5710_v34  ;;  %3856 = vmatprep.mubr.msk.bf16.mxu1 %vm4911_vm0, %v4910_v0  ;;  %v1077_v43 = vadd.f32 1.0, %v4404_v38  ;;  %v4406_v48 = vpop.eup %4405  ;;  %v983_v55 = vmul.f32 0.5, %v5687_v37  ;;  %v1020_v2 = vmul.f32 0.70710677, %v5741_v41  ;;  %v5756_v1 = vadd.f32 %v5745_v46, %v927_v9 }
 0x1c1   : > { %3866 = vmatprep.subr.bf16.mxu1 %v4910_v0  ;;  %v1078_v63 = vadd.f32 1.0, %v4406_v48  ;;  %v984_v3 = vmul.f32 0.5, %v5703_v50  ;;  %v985_v7 = vmul.f32 0.5, %v953_v45  ;;  %v1021_v8 = vmul.f32 0.70710677, %v5748_v24 }
 0x1c2   : > { %v4408_v60 = vpop.eup %4407  ;;  %v1108_v37 = vmul.f32 %v1076_v39, %v980_v58  ;;  %v1109_v42 = vmul.f32 %v1077_v43, %v981_v25  ;;  %4417 = verf.f32 %v1020_v2  ;;  %v986_v45 = vmul.f32 0.5, %v5708_v62 }
 0x1c3   : > { %v1079_v11 = vadd.f32 1.0, %v4408_v60  ;;  %v1110_v50 = vmul.f32 %v1078_v63, %v982_v27  ;;  %4419 = verf.f32 %v1021_v8  ;;  %v1022_v17 = vmul.f32 0.70710677, %v5751_v47  ;;  %v901_v60 = vld [vmem:[%s5366_s4 + $0xa8] sm:$0xff]  ;;  %v902_v63 = vld [vmem:[%s5366_s4 + $0xb0] sm:$0xff] }
 0x1c4   : > { %v4410_v5 = vpop.eup %4409  ;;  %v1023_v18 = vmul.f32 0.70710677, %v5756_v1  ;;  %v929_v15 = vmul.f32 %v5776_v44, %v897_v61  ;;  %v931_v23 = vmul.f32 %v5776_v44, %v899_v13  ;;  %v1154_v25 = vpack.c.bf16 %v1109_v42, %v1108_v37  ;;  %v903_v42 = vld [vmem:[%s5366_s4 + $0xb8] sm:$0xff] }
 0x1c5   : > { %3851 = vmatmul.mubr.msk.bf16.vlgmr.msra.gmra.mrb[28].mxu0 %vm1177_vm1, %v5464_v35  ;;  %v1111_v58 = vmul.f32 %v1079_v11, %v983_v55  ;;  %v4412_v56 = vpop.eup %4411  ;;  %v1080_v62 = vadd.f32 1.0, %v4410_v5  ;;  %4421 = verf.f32 %v1022_v17  ;;  %v987_v32 = vmul.f32 0.5, %v5714_v6 }
 0x1c6   : > { %3861 = vmatpush3.bf16.msra.mxu0 %v1152_v4  ;;  %3862 = vmatprep.mubr.msk.bf16.mxu0 %vm4911_vm0, %v4910_v0  ;;  %v930_v4 = vmul.f32 %v5776_v44, %v898_v12  ;;  %v1081_v26 = vadd.f32 1.0, %v4412_v56  ;;  %4423 = verf.f32 %v1023_v18  ;;  %v4414_v31 = vpop.eup %4413  ;;  %v5790_v33 = vadd.f32 %v5745_v46, %v929_v15  ;;  %v904_v18 = vld [vmem:[%s5366_s4 + $0xc0] sm:$0xff] }
 0x1c7   : > { %3857 = vmatmul.mubr.msk.bf16.vlgmr.msra.gmra.mrb[28].mxu1 %vm1177_vm1, %v5464_v35  ;;  %3872 = vmatprep.subr.bf16.mxu0 %v4910_v0  ;;  %v928_v35 = vmul.f32 %v5776_v44, %v896_v21  ;;  %v5796_v39 = vadd.f32 %v5745_v46, %v931_v23  ;;  %v1155_v43 = vpack.c.bf16 %v1111_v58, %v1110_v50  ;;  %v1082_v27 = vadd.f32 1.0, %v4414_v31  ;;  %v900_v21 = vld [vmem:[%s5366_s4 + $0xa0] sm:$0xff] }
 0x1c8   : > { %3867 = vmatpush3.bf16.msra.mxu1 %v1153_v53  ;;  %3868 = vmatprep.mubr.msk.bf16.mxu1 %vm4911_vm0, %v4910_v0  ;;  %v5793_v38 = vadd.f32 %v5745_v46, %v930_v4  ;;  %v4416_v9 = vpop.eup %4415  ;;  %v1112_v53 = vmul.f32 %v1080_v62, %v984_v3  ;;  %v1113_v6 = vmul.f32 %v1081_v26, %v985_v7  ;;  %v1025_v2 = vmul.f32 0.70710677, %v5790_v33 }
 0x1c9   : > { %3878 = vmatprep.subr.bf16.mxu1 %v4910_v0  ;;  %v5786_v30 = vadd.f32 %v5745_v46, %v928_v35  ;;  %v1083_v55 = vadd.f32 1.0, %v4416_v9  ;;  %v1114_v8 = vmul.f32 %v1082_v27, %v986_v45  ;;  %v988_v61 = vmul.f32 0.5, %v5741_v41  ;;  %v905_v9 = vld [vmem:[%s5366_s4 + $0xc8] sm:$0xff]  ;;  %v906_v27 = vld [vmem:[%s5366_s4 + $0xd0] sm:$0xff] }
 0x1ca   : > { %v989_v37 = vmul.f32 0.5, %v5748_v24  ;;  %v1026_v7 = vmul.f32 0.70710677, %v5793_v38  ;;  %v1027_v11 = vmul.f32 0.70710677, %v5796_v39  ;;  %v990_v41 = vmul.f32 0.5, %v5751_v47 }
 0x1cb   : > { %v1024_v48 = vmul.f32 0.70710677, %v5786_v30  ;;  %v1115_v3 = vmul.f32 %v1083_v55, %v987_v32  ;;  %v932_v24 = vmul.f32 %v5776_v44, %v900_v21  ;;  %v933_v13 = vmul.f32 %v5776_v44, %v901_v60  ;;  %v907_v55 = vld [vmem:[%s5366_s4 + $0xd8] sm:$0xff] }
 0x1cc   : > { %v4418_v12 = vpop.eup %4417  ;;  %v934_v50 = vmul.f32 %v5776_v44, %v902_v63  ;;  %v1156_v17 = vpack.c.bf16 %v1113_v6, %v1112_v53  ;;  %v935_v58 = vmul.f32 %v5776_v44, %v903_v42  ;;  %v991_v62 = vmul.f32 0.5, %v5756_v1 }
 0x1cd   : > { %3863 = vmatmul.mubr.msk.bf16.vlgmr.msra.gmra.mrb[32].mxu0 %vm1177_vm1, %v5780_v22  ;;  %4425 = verf.f32 %v1024_v48  ;;  %v4420_v45 = vpop.eup %4419  ;;  %v1084_v5 = vadd.f32 1.0, %v4418_v12  ;;  %v5825_v47 = vadd.f32 %v5745_v46, %v932_v24  ;;  %v5828_v15 = vadd.f32 %v5745_v46, %v933_v13 }
 0x1ce   : > { %3873 = vmatpush3.bf16.msra.mxu0 %v1154_v25  ;;  %3874 = vmatprep.mubr.msk.bf16.mxu0 %vm4911_vm0, %v4910_v0  ;;  %4427 = verf.f32 %v1025_v2  ;;  %v1085_v35 = vadd.f32 1.0, %v4420_v45  ;;  %v5832_v4 = vadd.f32 %v5745_v46, %v934_v50  ;;  %v5835_v23 = vadd.f32 %v5745_v46, %v935_v58 }
 0x1cf   : > { %3869 = vmatmul.mubr.msk.bf16.vlgmr.msra.gmra.mrb[32].mxu1 %vm1177_vm1, %v5780_v22  ;;  %3884 = vmatprep.subr.bf16.mxu0 %v4910_v0  ;;  %4429 = verf.f32 %v1026_v7  ;;  %v4422_v56 = vpop.eup %4421  ;;  %v1157_v26 = vpack.c.bf16 %v1115_v3, %v1114_v8  ;;  %v1116_v31 = vmul.f32 %v1084_v5, %v988_v61  ;;  %v1028_v1 = vmul.f32 0.70710677, %v5825_v47 }
 0x1d0   : > { %3879 = vmatpush3.bf16.msra.mxu1 %v1155_v43  ;;  %3880 = vmatprep.mubr.msk.bf16.mxu1 %vm4911_vm0, %v4910_v0  ;;  %4431 = verf.f32 %v1027_v11  ;;  %v4424_v25 = vpop.eup %4423  ;;  %v1086_v32 = vadd.f32 1.0, %v4422_v56  ;;  %v936_v43 = vmul.f32 %v5776_v44, %v904_v18  ;;  %v1117_v48 = vmul.f32 %v1085_v35, %v989_v37 }
 0x1d1   : > { %3890 = vmatprep.subr.bf16.mxu1 %v4910_v0  ;;  %v1087_v53 = vadd.f32 1.0, %v4424_v25  ;;  %v1029_v6 = vmul.f32 0.70710677, %v5828_v15  ;;  %v992_v21 = vmul.f32 0.5, %v5786_v30  ;;  %v1030_v60 = vmul.f32 0.70710677, %v5832_v4 }
 0x1d2   : > { %v1118_v2 = vmul.f32 %v1086_v32, %v990_v41  ;;  %4433 = verf.f32 %v1028_v1  ;;  %v1031_v8 = vmul.f32 0.70710677, %v5835_v23  ;;  %v937_v61 = vmul.f32 %v5776_v44, %v905_v9  ;;  %v908_v25 = vld [vmem:[%s5366_s4 + $0xe0] sm:$0xff]  ;;  %v911_v32 = vld [vmem:[%s5366_s4 + $0xf8] sm:$0xff] }
 0x1d3   : > { %v1119_v63 = vmul.f32 %v1087_v53, %v991_v62  ;;  %4435 = verf.f32 %v1029_v6  ;;  %v5857_v30 = vadd.f32 %v5745_v46, %v936_v43  ;;  %v938_v42 = vmul.f32 %v5776_v44, %v906_v27 }
 0x1d4   : > { %v939_v3 = vmul.f32 %v5776_v44, %v907_v55  ;;  %v1158_v11 = vpack.c.bf16 %v1117_v48, %v1116_v31  ;;  %v993_v12 = vmul.f32 0.5, %v5790_v33  ;;  %4437 = verf.f32 %v1030_v60  ;;  %v910_v31 = vld [vmem:[%s5366_s4 + $0xf0] sm:$0xff] }
 0x1d5   : > { %3875 = vmatmul.mubr.msk.bf16.vlgmr.msra.gmra.mrb[36].mxu0 %vm1177_vm1, %v5780_v22  ;;  %v5864_v41 = vadd.f32 %v5745_v46, %v937_v61  ;;  %4439 = verf.f32 %v1031_v8  ;;  %v1032_v50 = vmul.f32 0.70710677, %v5857_v30  ;;  %v995_v5 = vmul.f32 0.5, %v5796_v39 }
 0x1d6   : > { %3885 = vmatpush3.bf16.msra.mxu0 %v1156_v17  ;;  %3886 = vmatprep.mubr.msk.bf16.mxu0 %vm4911_vm0, %v4910_v0  ;;  %v994_v17 = vmul.f32 0.5, %v5793_v38  ;;  %v5871_v58 = vadd.f32 %v5745_v46, %v938_v42  ;;  %v1159_v35 = vpack.c.bf16 %v1119_v63, %v1118_v2  ;;  %v5874_v62 = vadd.f32 %v5745_v46, %v939_v3 }
 0x1d7   : > { %3881 = vmatmul.mubr.msk.bf16.vlgmr.msra.gmra.mrb[36].mxu1 %vm1177_vm1, %v5780_v22  ;;  %3896 = vmatprep.subr.bf16.mxu0 %v4910_v0  ;;  %v4426_v37 = vpop.eup %4425  ;;  %v1033_v33 = vmul.f32 0.70710677, %v5864_v41  ;;  %4441 = verf.f32 %v1032_v50  ;;  %v940_v53 = vmul.f32 %v5776_v44, %v908_v25  ;;  %v942_v55 = vmul.f32 %v5776_v44, %v910_v31 }
 0x1d8   : > { %3891 = vmatpush3.bf16.msra.mxu1 %v1157_v26  ;;  %3892 = vmatprep.mubr.msk.bf16.mxu1 %vm4911_vm0, %v4910_v0  ;;  %v4428_v7 = vpop.eup %4427  ;;  %v1088_v24 = vadd.f32 1.0, %v4426_v37  ;;  %v909_v26 = vld [vmem:[%s5366_s4 + $0xe8] sm:$0xff]  ;;  %v1034_v39 = vmul.f32 0.70710677, %v5871_v58  ;;  %v1035_v27 = vmul.f32 0.70710677, %v5874_v62  ;;  %v943_v2 = vmul.f32 %v5776_v44, %v911_v32 }
 0x1d9   : > { %3902 = vmatprep.subr.bf16.mxu1 %v4910_v0  ;;  %v1089_v13 = vadd.f32 1.0, %v4428_v7  ;;  %v4430_v45 = vpop.eup %4429  ;;  %4443 = verf.f32 %v1033_v33  ;;  %v941_v1 = vmul.f32 %v5776_v44, %v909_v26  ;;  %v996_v60 = vmul.f32 0.5, %v5825_v47 }
 0x1da   : > { %v4432_v18 = vpop.eup %4431  ;;  %v1090_v56 = vadd.f32 1.0, %v4430_v45  ;;  %v1120_v9 = vmul.f32 %v1088_v24, %v992_v21  ;;  %4445 = verf.f32 %v1034_v39  ;;  %v997_v63 = vmul.f32 0.5, %v5828_v15 }
 0x1db   : > { %v1091_v38 = vadd.f32 1.0, %v4432_v18  ;;  %v1121_v43 = vmul.f32 %v1089_v13, %v993_v12  ;;  %4447 = verf.f32 %v1035_v27  ;;  %v972_v8 = vadd.f32 %v5745_v46, %v940_v53 }
 0x1dc   : > { %v1122_v48 = vmul.f32 %v1090_v56, %v994_v17  ;;  %v4434_v21 = vpop.eup %4433  ;;  %v5900_v61 = vadd.f32 %v5745_v46, %v941_v1  ;;  %v5903_v7 = vadd.f32 %v5745_v46, %v942_v55  ;;  %v5906_v44 = vadd.f32 %v5745_v46, %v943_v2 }
 0x1dd   : > { %3887 = vmatmul.mubr.msk.bf16.vlgmr.msra.gmra.mrb[40].mxu0 %vm1177_vm1, %v5780_v22  ;;  %v1123_v6 = vmul.f32 %v1091_v38, %v995_v5  ;;  %v4436_v37 = vpop.eup %4435  ;;  %v1160_v42 = vpack.c.bf16 %v1121_v43, %v1120_v9  ;;  %v1092_v3 = vadd.f32 1.0, %v4434_v21  ;;  %v998_v47 = vmul.f32 0.5, %v5832_v4 }
 0x1de   : > { %3897 = vmatpush3.bf16.msra.mxu0 %v1158_v11  ;;  %3898 = vmatprep.mubr.msk.bf16.mxu0 %vm4911_vm0, %v4910_v0  ;;  %v4438_v11 = vpop.eup %4437  ;;  %v1093_v12 = vadd.f32 1.0, %v4436_v37  ;;  %v1036_v24 = vmul.f32 0.70710677, %v972_v8  ;;  %v999_v50 = vmul.f32 0.5, %v5835_v23  ;;  %v1037_v17 = vmul.f32 0.70710677, %v5900_v61 }
 0x1df   : > { %3893 = vmatmul.mubr.msk.bf16.vlgmr.msra.gmra.mrb[40].mxu1 %vm1177_vm1, %v5780_v22  ;;  %3908 = vmatprep.subr.bf16.mxu0 %v4910_v0  ;;  %v4440_v15 = vpop.eup %4439  ;;  %v1161_v13 = vpack.c.bf16 %v1123_v6, %v1122_v48  ;;  %v1094_v45 = vadd.f32 1.0, %v4438_v11  ;;  %v1124_v5 = vmul.f32 %v1092_v3, %v996_v60  ;;  %v1038_v18 = vmul.f32 0.70710677, %v5903_v7 }
 0x1e0   : > { %3903 = vmatpush3.bf16.msra.mxu1 %v1159_v35  ;;  %3904 = vmatprep.mubr.msk.bf16.mxu1 %vm4911_vm0, %v4910_v0  ;;  %v1095_v33 = vadd.f32 1.0, %v4440_v15  ;;  %4449 = verf.f32 %v1036_v24  ;;  %v1125_v4 = vmul.f32 %v1093_v12, %v997_v63  ;;  %v1039_v23 = vmul.f32 0.70710677, %v5906_v44 }
 0x1e1   : > { %3914 = vmatprep.subr.bf16.mxu1 %v4910_v0  ;;  %v4442_v46 = vpop.eup %4441  ;;  %4451 = verf.f32 %v1037_v17  ;;  %v1126_v56 = vmul.f32 %v1094_v45, %v998_v47  ;;  %v1000_v38 = vmul.f32 0.5, %v5857_v30  ;;  %v1001_v32 = vmul.f32 0.5, %v5864_v41  ;;  %v4305_v45 = vld [vmem:[#allocation17] sm:$0xff]  }
 0x1e2   : > { %v1127_v25 = vmul.f32 %v1095_v33, %v999_v50  ;;  %4453 = verf.f32 %v1038_v18  ;;  %v1162_v31 = vpack.c.bf16 %v1125_v4, %v1124_v5  ;;  %v1096_v9 = vadd.f32 1.0, %v4442_v46  ;;  %v4306_v5 = vld [vmem:[#allocation17 + $0x8] sm:$0xff]   ;;  %v4307_v33 = vld [vmem:[#allocation17 + $0x10] sm:$0xff]   ;;  %v4308_v46 = vld [vmem:[#allocation17 + $0x18] sm:$0xff]  }
 0x1e3   : > { %v4444_v35 = vpop.eup %4443  ;;  %4455 = verf.f32 %v1039_v23  ;;  %v1002_v27 = vmul.f32 0.5, %v5871_v58  ;;  %v1003_v53 = vmul.f32 0.5, %v5874_v62  ;;  %v1004_v21 = vmul.f32 0.5, %v972_v8  ;;  %v4310_v4 = vld [vmem:[#allocation17 + $0x28] sm:$0xff]   ;;  %v4312_v18 = vld [vmem:[#allocation17 + $0x38] sm:$0xff]   ;;  %v4313_v23 = vld [vmem:[#allocation16] sm:$0xff]  }
 0x1e4   : > { %v4446_v26 = vpop.eup %4445  ;;  %v1097_v43 = vadd.f32 1.0, %v4444_v35  ;;  %v1163_v48 = vpack.c.bf16 %v1127_v25, %v1126_v56  ;;  %v1128_v30 = vmul.f32 %v1096_v9, %v1000_v38  ;;  %v1005_v37 = vmul.f32 0.5, %v5900_v61  ;;  %v5962_v35 = vld [vmem:[#allocation19] sm:$0xff]  }
 0x1e5   : > { %3899 = vmatmul.mubr.msk.bf16.vlgmr.msra.gmra.mrb[44].mxu0 %vm1177_vm1, %v5780_v22  ;;  %v4448_v39 = vpop.eup %4447  ;;  %v1098_v1 = vadd.f32 1.0, %v4446_v26  ;;  %v1006_v12 = vmul.f32 0.5, %v5903_v7  ;;  %v1007_v24 = vmul.f32 0.5, %v5906_v44  ;;  %v5965_v56 = vld [vmem:[#allocation13] sm:$0xff]  ;;  %v5967_v26 = vld [vmem:[#allocation13 + $0x8] sm:$0xff] }
 0x1e6   : > { %3909 = vmatpush3.bf16.msra.mxu0 %v1160_v42  ;;  %3910 = vmatprep.mubr.msk.bf16.mxu0 %vm4911_vm0, %v4910_v0  ;;  %v1099_v6 = vadd.f32 1.0, %v4448_v39  ;;  %v1129_v55 = vmul.f32 %v1097_v43, %v1001_v32 }
 0x1e7   : > { %3905 = vmatmul.mubr.msk.bf16.vlgmr.msra.gmra.mrb[44].mxu1 %vm1177_vm1, %v5780_v22  ;;  %3920 = vmatprep.subr.bf16.mxu0 %v4910_v0  ;;  %v1130_v58 = vmul.f32 %v1098_v1, %v1002_v27 }
 0x1e8   : > { %3915 = vmatpush3.bf16.msra.mxu1 %v1161_v13  ;;  %3916 = vmatprep.mubr.msk.bf16.mxu1 %vm4911_vm0, %v4910_v0  ;;  %v1131_v62 = vmul.f32 %v1099_v6, %v1003_v53  ;;  %v1164_v63 = vpack.c.bf16 %v1129_v55, %v1128_v30 }
 0x1e9   : > { %3926 = vmatprep.subr.bf16.mxu1 %v4910_v0 }
 0x1ea   : > { %v4450_v2 = vpop.eup %4449  ;;  %v1165_v47 = vpack.c.bf16 %v1131_v62, %v1130_v58 }
 0x1eb   : > { %v4452_v41 = vpop.eup %4451  ;;  %v1100_v42 = vadd.f32 1.0, %v4450_v2  ;;  %v4314_v2 = vld [vmem:[#allocation16 + $0x8] sm:$0xff]  }
 0x1ec   : > { %v4454_v60 = vpop.eup %4453  ;;  %v1101_v3 = vadd.f32 1.0, %v4452_v41 }
 0x1ed   : > { %3911 = vmatmul.mubr.msk.bf16.vlgmr.msra.gmra.mrb[48].mxu0 %vm1177_vm1, %v5780_v22  ;;  %v4456_v11 = vpop.eup %4455  ;;  %v1102_v15 = vadd.f32 1.0, %v4454_v60  ;;  %v1132_v8 = vmul.f32 %v1100_v42, %v1004_v21 }
 0x1ee   : > { %3921 = vmatpush3.bf16.msra.mxu0 %v1162_v31  ;;  %3922 = vmatprep.mubr.msk.bf16.mxu0 %vm4911_vm0, %v4910_v0  ;;  %v1103_v13 = vadd.f32 1.0, %v4456_v11  ;;  %v1133_v50 = vmul.f32 %v1101_v3, %v1005_v37  ;;  %v4315_v11 = vld [vmem:[#allocation16 + $0x10] sm:$0xff]  }
 0x1ef   : > { %3917 = vmatmul.mubr.msk.bf16.vlgmr.msra.gmra.mrb[48].mxu1 %vm1177_vm1, %v5780_v22  ;;  %3932 = vmatprep.subr.bf16.mxu0 %v4910_v0  ;;  %v1134_v61 = vmul.f32 %v1102_v15, %v1006_v12 }
 0x1f0   : > { %3927 = vmatpush3.bf16.msra.mxu1 %v1163_v48  ;;  %3928 = vmatprep.mubr.msk.bf16.mxu1 %vm4911_vm0, %v4910_v0  ;;  %v1135_v7 = vmul.f32 %v1103_v13, %v1007_v24  ;;  %v1166_v44 = vpack.c.bf16 %v1133_v50, %v1132_v8  ;;  %v4316_v8 = vld [vmem:[#allocation16 + $0x18] sm:$0xff]  }
 0x1f1   : > { %3938 = vmatprep.subr.bf16.mxu1 %v4910_v0 }
 0x1f2   : > { %v1167_v17 = vpack.c.bf16 %v1135_v7, %v1134_v61 }
 0x1f5   : > { %3923 = vmatmul.mubr.msk.bf16.vlgmr.msra.gmra.mrb[52].mxu0 %vm1177_vm1, %v5780_v22 }
 0x1f6   : > { %3933 = vmatpush3.bf16.msra.mxu0 %v1164_v63  ;;  %3934 = vmatprep.mubr.msk.bf16.mxu0 %vm4911_vm0, %v4910_v0 }
 0x1f7   : > { %3929 = vmatmul.mubr.msk.bf16.vlgmr.msra.gmra.mrb[52].mxu1 %vm1177_vm1, %v5780_v22  ;;  %3944 = vmatprep.subr.bf16.mxu0 %v4910_v0 }
 0x1f8   : > { %3939 = vmatpush3.bf16.msra.mxu1 %v1165_v47  ;;  %3940 = vmatprep.mubr.msk.bf16.mxu1 %vm4911_vm0, %v4910_v0 }
 0x1f9   : > { %3950 = vmatprep.subr.bf16.mxu1 %v4910_v0 }
 0x1fd   : > { %3935 = vmatmul.mubr.msk.bf16.vlgmr.msra.gmra.mrb[56].mxu0 %vm1177_vm1, %v5780_v22 }
 0x1fe   : > { %3945 = vmatpush3.bf16.msra.mxu0 %v1166_v44  ;;  %3946 = vmatprep.mubr.msk.bf16.mxu0 %vm4911_vm0, %v4910_v0 }
 0x1ff   : > { %3941 = vmatmul.mubr.msk.bf16.vlgmr.msra.gmra.mrb[56].mxu1 %vm1177_vm1, %v5780_v22  ;;  %3956 = vmatprep.subr.bf16.mxu0 %v4305_v45 }
 0x200   : > { %3951 = vmatpush3.bf16.msra.mxu1 %v1167_v17  ;;  %3952 = vmatprep.mubr.msk.bf16.mxu1 %vm4911_vm0, %v4910_v0  ;;  %v4309_v0 = vld [vmem:[#allocation17 + $0x20] sm:$0xff]  }
 0x201   : > { %4100 = vmatprep.subr.bf16.mxu1 %v4305_v45 }
 0x205   : > { %3947 = vmatmul.mubr.msk.bf16.vlgmr.msra.gmra.mrb[60].mxu0 %vm1177_vm1, %v5780_v22 }
 0x206   : > { %3957 = vmatpush3.bf16.msra.mxu0 %v4305_v45 }
 0x207   : > { %3953 = vmatmul.mubr.msk.bf16.vlgmr.msra.gmra.mrb[60].mxu1 %vm1177_vm1, %v5780_v22  ;;  %3958 = vmatprep.subr.bf16.mxu0 %v4306_v5  ;;  %v4311_v22 = vld [vmem:[#allocation17 + $0x30] sm:$0xff]  }
 0x208   : > { %4108 = vmatpush3.bf16.msra.mxu1 %v4305_v45 }
 0x209   : > { %4101 = vmatprep.subr.bf16.mxu1 %v4306_v5 }
 0x20a   : > { %3959 = vmatpush3.bf16.msra.mxu0 %v4306_v5 }
 0x20b   : > { %3960 = vmatprep.subr.bf16.mxu0 %v4307_v33 }
 0x20c   : > { %4109 = vmatpush3.bf16.msra.mxu1 %v4306_v5 }
 0x20d   : > { %4102 = vmatprep.subr.bf16.mxu1 %v4307_v33 }
 0x20e   : > { %3961 = vmatpush3.bf16.msra.mxu0 %v4307_v33 }
 0x20f   : > { %3962 = vmatprep.subr.bf16.mxu0 %v4308_v46 }
 0x210   : > { %4110 = vmatpush3.bf16.msra.mxu1 %v4307_v33 }
 0x211   : > { %4103 = vmatprep.subr.bf16.mxu1 %v4308_v46 }
 0x212   : > { %3963 = vmatpush3.bf16.msra.mxu0 %v4308_v46 }
 0x213   : > { %3964 = vmatprep.subr.bf16.mxu0 %v4309_v0 }
 0x214   : > { %4111 = vmatpush3.bf16.msra.mxu1 %v4308_v46 }
 0x215   : > { %4104 = vmatprep.subr.bf16.mxu1 %v4309_v0 }
 0x216   : > { %3965 = vmatpush3.bf16.msra.mxu0 %v4309_v0 }
 0x217   : > { %3966 = vmatprep.subr.bf16.mxu0 %v4310_v4 }
 0x218   : > { %4112 = vmatpush3.bf16.msra.mxu1 %v4309_v0  ;;  %v4317_v0 = vld [vmem:[#allocation16 + $0x20] sm:$0xff]  }
 0x219   : > { %4105 = vmatprep.subr.bf16.mxu1 %v4310_v4 }
 0x21a   : > { %3967 = vmatpush3.bf16.msra.mxu0 %v4310_v4 }
 0x21b   : > { %3968 = vmatprep.subr.bf16.mxu0 %v4311_v22 }
 0x21c   : > { %4113 = vmatpush3.bf16.msra.mxu1 %v4310_v4 }
 0x21d   : > { %4106 = vmatprep.subr.bf16.mxu1 %v4311_v22 }
 0x21e   : > { %3969 = vmatpush3.bf16.msra.mxu0 %v4311_v22 }
 0x21f   : > { %3970 = vmatprep.subr.bf16.mxu0 %v4312_v18 }
 0x220   : > { %4114 = vmatpush3.bf16.msra.mxu1 %v4311_v22 }
 0x221   : > { %4107 = vmatprep.subr.bf16.mxu1 %v4312_v18 }
 0x222   : > { %3971 = vmatpush3.bf16.msra.mxu0 %v4312_v18 }
 0x223   : > { %4004 = vmatprep.subr.bf16.mxu0 %v4313_v23 }
 0x224   : > { %4115 = vmatpush3.bf16.msra.mxu1 %v4312_v18 }
 0x225   : > { %4052 = vmatprep.subr.bf16.mxu1 %v5962_v35 }
 0x260   : > { %v1215_v25 = vpop.f32.mrb[0].mxu0 }
 0x261   : > { %v3768_v38 = vpop.f32.mrb[1].mxu0  ;;  %v1216_v32 = vadd.f32 %v1215_v25, %v5965_v56 }
 0x262   : > { %v1256_v39 = vpop.f32.mrb[0].mxu1  ;;  %v1218_v31 = vpop.f32.mrb[2].mxu0  ;;  %v4318_v38 = vld [vmem:[#allocation16 + $0x28] sm:$0xff]  }
 0x263   : > { %v1257_v9 = vadd.f32 %v1256_v39, %v5965_v56  ;;  %v3774_v43 = vpop.f32.mrb[1].mxu1  ;;  %v1219_v27 = vadd.f32 %v1218_v31, %v5967_v26  ;;  %v3769_v48 = vpop.f32.mrb[3].mxu0 }
 0x264   : > { %v1259_v53 = vpop.f32.mrb[2].mxu1 }
 0x265   : > { %v2505_v1 = vpack.c.bf16 %v1219_v27, %v1216_v32  ;;  %v1260_v6 = vadd.f32 %v1259_v53, %v5967_v26  ;;  %v3775_v30 = vpop.f32.mrb[3].mxu1 }
 0x267   : > { %v2506_v55 = vpack.c.bf16 %v1260_v6, %v1257_v9  ;;  %3972 = vmatprep.mubr.bf16.mxu0 %v2505_v1  ;;  %v4319_v6 = vld [vmem:[#allocation16 + $0x30] sm:$0xff]  }
 0x268   : > { %v1297_v41 = vpop.f32.mrb[4].mxu0 }
 0x269   : > { %3973 = vmatmul.mubr.bf16.vlgmr.msra.gmra.mrb[64].mxu0 %v2506_v55  ;;  %v3780_v58 = vpop.f32.mrb[5].mxu0  ;;  %v1298_v60 = vadd.f32 %v1297_v41, %v5965_v56 }
 0x26a   : > { %v1338_v62 = vpop.f32.mrb[4].mxu1  ;;  %4005 = vmatpush3.bf16.msra.mxu0 %v4313_v23  ;;  %v1300_v21 = vpop.f32.mrb[6].mxu0 }
 0x26b   : > { %v1339_v63 = vadd.f32 %v1338_v62, %v5965_v56  ;;  %v3786_v37 = vpop.f32.mrb[5].mxu1  ;;  %v1301_v42 = vadd.f32 %v1300_v21, %v5967_v26  ;;  %v3781_v3 = vpop.f32.mrb[7].mxu0  ;;  %4006 = vmatprep.subr.bf16.mxu0 %v4314_v2  ;;  %v4320_v62 = vld [vmem:[#allocation16 + $0x38] sm:$0xff]  }
 0x26c   : > { %v1341_v12 = vpop.f32.mrb[6].mxu1 }
 0x26d   : > { %v2507_v47 = vpack.c.bf16 %v1301_v42, %v1298_v60  ;;  %v1342_v24 = vadd.f32 %v1341_v12, %v5967_v26  ;;  %v3787_v15 = vpop.f32.mrb[7].mxu1 }
 0x26e   : > { %4007 = vmatpush3.bf16.msra.mxu0 %v4314_v2 }
 0x26f   : > { %v2508_v13 = vpack.c.bf16 %v1342_v24, %v1339_v63  ;;  %3976 = vmatprep.mubr.bf16.mxu0 %v2507_v47  ;;  %4008 = vmatprep.subr.bf16.mxu0 %v4315_v11 }
 0x270   : > { %v1379_v50 = vpop.f32.mrb[8].mxu0 }
 0x271   : > { %3977 = vmatmul.mubr.bf16.gmra.mrb[68].mxu0 %v2508_v13  ;;  %v3792_v61 = vpop.f32.mrb[9].mxu0  ;;  %v1380_v45 = vadd.f32 %v1379_v50, %v5965_v56 }
 0x272   : > { %v1420_v7 = vpop.f32.mrb[8].mxu1  ;;  %4009 = vmatpush3.bf16.msra.mxu0 %v4315_v11  ;;  %v1382_v44 = vpop.f32.mrb[10].mxu0  ;;  %v4322_v61 = vld [vmem:[#allocation19 + $0x8] sm:$0xff]  }
 0x273   : > { %v1421_v17 = vadd.f32 %v1420_v7, %v5965_v56  ;;  %v3798_v5 = vpop.f32.mrb[9].mxu1  ;;  %v1383_v33 = vadd.f32 %v1382_v44, %v5967_v26  ;;  %v3793_v46 = vpop.f32.mrb[11].mxu0  ;;  %4010 = vmatprep.subr.bf16.mxu0 %v4316_v8 }
 0x274   : > { %v1423_v4 = vpop.f32.mrb[10].mxu1 }
 0x275   : > { %v2509_v22 = vpack.c.bf16 %v1383_v33, %v1380_v45  ;;  %v1424_v18 = vadd.f32 %v1423_v4, %v5967_v26  ;;  %v3799_v23 = vpop.f32.mrb[11].mxu1  ;;  %v4323_v4 = vld [vmem:[#allocation19 + $0x10] sm:$0xff]  }
 0x276   : > { %4011 = vmatpush3.bf16.msra.mxu0 %v4316_v8 }
 0x277   : > { %v2510_v25 = vpack.c.bf16 %v1424_v18, %v1421_v17  ;;  %3980 = vmatprep.mubr.bf16.mxu0 %v2509_v22  ;;  %4012 = vmatprep.subr.bf16.mxu0 %v4317_v0 }
 0x278   : > { %v1461_v39 = vpop.f32.mrb[12].mxu0 }
 0x279   : > { %3981 = vmatmul.mubr.bf16.gmra.mrb[72].mxu0 %v2510_v25  ;;  %v3804_v31 = vpop.f32.mrb[13].mxu0  ;;  %v1462_v43 = vadd.f32 %v1461_v39, %v5965_v56 }
 0x27a   : > { %v1502_v32 = vpop.f32.mrb[12].mxu1  ;;  %4013 = vmatpush3.bf16.msra.mxu0 %v4317_v0  ;;  %v1464_v9 = vpop.f32.mrb[14].mxu0 }
 0x27b   : > { %v1503_v27 = vadd.f32 %v1502_v32, %v5965_v56  ;;  %v3810_v48 = vpop.f32.mrb[13].mxu1  ;;  %v1465_v53 = vadd.f32 %v1464_v9, %v5967_v26  ;;  %v3805_v1 = vpop.f32.mrb[15].mxu0  ;;  %4014 = vmatprep.subr.bf16.mxu0 %v4318_v38 }
 0x27c   : > { %v1505_v30 = vpop.f32.mrb[14].mxu1 }
 0x27d   : > { %v2511_v55 = vpack.c.bf16 %v1465_v53, %v1462_v43  ;;  %v1506_v2 = vadd.f32 %v1505_v30, %v5967_v26  ;;  %v3811_v41 = vpop.f32.mrb[15].mxu1  ;;  %v4325_v53 = vld [vmem:[#allocation19 + $0x20] sm:$0xff]  }
 0x27e   : > { %4015 = vmatpush3.bf16.msra.mxu0 %v4318_v38 }
 0x27f   : > { %v2512_v58 = vpack.c.bf16 %v1506_v2, %v1503_v27  ;;  %3984 = vmatprep.mubr.bf16.mxu0 %v2511_v55  ;;  %4016 = vmatprep.subr.bf16.mxu0 %v4319_v6 }
 0x280   : > { %v1543_v21 = vpop.f32.mrb[16].mxu0 }
 0x281   : > { %3985 = vmatmul.mubr.bf16.gmra.mrb[76].mxu0 %v2512_v58  ;;  %v3816_v60 = vpop.f32.mrb[17].mxu0  ;;  %v1544_v42 = vadd.f32 %v1543_v21, %v5965_v56 }
 0x282   : > { %v1584_v63 = vpop.f32.mrb[16].mxu1  ;;  %4017 = vmatpush3.bf16.msra.mxu0 %v4319_v6  ;;  %v1546_v37 = vpop.f32.mrb[18].mxu0  ;;  %4020 = vmatprep.mubr.bf16.mxu0 %v5460_v29 }
 0x283   : > { %v1585_v3 = vadd.f32 %v1584_v63, %v5965_v56  ;;  %v3822_v11 = vpop.f32.mrb[17].mxu1  ;;  %v1547_v12 = vadd.f32 %v1546_v37, %v5967_v26  ;;  %v3817_v47 = vpop.f32.mrb[19].mxu0  ;;  %4018 = vmatprep.subr.bf16.mxu0 %v4320_v62 }
 0x284   : > { %v1587_v24 = vpop.f32.mrb[18].mxu1 }
 0x285   : > { %v2513_v15 = vpack.c.bf16 %v1547_v12, %v1544_v42  ;;  %v1588_v13 = vadd.f32 %v1587_v24, %v5967_v26  ;;  %v3823_v8 = vpop.f32.mrb[19].mxu1 }
 0x286   : > { %4019 = vmatpush3.bf16.msra.mxu0 %v4320_v62 }
 0x287   : > { %v2514_v50 = vpack.c.bf16 %v1588_v13, %v1585_v3  ;;  %3988 = vmatprep.mubr.bf16.mxu1 %v2513_v15  ;;  %v4327_v3 = vld [vmem:[#allocation19 + $0x30] sm:$0xff]  }
 0x288   : > { %v1625_v7 = vpop.f32.mrb[20].mxu0  ;;  %v6009_v15 = vld [vmem:[#allocation14] sm:$0xff] }
 0x289   : > { %3989 = vmatmul.mubr.bf16.vlgmr.msra.gmra.mrb[64].mxu1 %v2514_v50  ;;  %4021 = vmatmul.mubr.bf16.vlgmr.msra.gmra.mrb[64].mxu0 %v5467_v40  ;;  %v3828_v29 = vpop.f32.mrb[21].mxu0  ;;  %v1626_v17 = vadd.f32 %v1625_v7, %v5965_v56 }
 0x28a   : > { %v1666_v44 = vpop.f32.mrb[20].mxu1  ;;  %4053 = vmatpush3.bf16.msra.mxu1 %v5962_v35  ;;  %v1628_v45 = vpop.f32.mrb[22].mxu0  ;;  %4024 = vmatprep.mubr.bf16.mxu0 %v5475_v51  ;;  %v4324_v51 = vld [vmem:[#allocation19 + $0x18] sm:$0xff]  }
 0x28b   : > { %v1667_v5 = vadd.f32 %v1666_v44, %v5965_v56  ;;  %v3834_v33 = vpop.f32.mrb[21].mxu1  ;;  %v1629_v46 = vadd.f32 %v1628_v45, %v5967_v26  ;;  %v3829_v0 = vpop.f32.mrb[23].mxu0  ;;  %4054 = vmatprep.subr.bf16.mxu1 %v4322_v61 }
 0x28c   : > { %v1669_v22 = vpop.f32.mrb[22].mxu1 }
 0x28d   : > { %v2515_v18 = vpack.c.bf16 %v1629_v46, %v1626_v17  ;;  %v1670_v40 = vadd.f32 %v1669_v22, %v5967_v26  ;;  %v3835_v23 = vpop.f32.mrb[23].mxu1 }
 0x28e   : > { %4055 = vmatpush3.bf16.msra.mxu1 %v4322_v61 }
 0x28f   : > { %v2516_v35 = vpack.c.bf16 %v1670_v40, %v1667_v5  ;;  %3992 = vmatprep.mubr.bf16.mxu1 %v2515_v18  ;;  %4056 = vmatprep.subr.bf16.mxu1 %v4323_v4 }
 0x290   : > { %v1707_v25 = vpop.f32.mrb[24].mxu0 }
 0x291   : > { %3993 = vmatmul.mubr.bf16.gmra.mrb[68].mxu1 %v2516_v35  ;;  %4025 = vmatmul.mubr.bf16.gmra.mrb[68].mxu0 %v5486_v59  ;;  %v3840_v38 = vpop.f32.mrb[25].mxu0  ;;  %v1708_v32 = vadd.f32 %v1707_v25, %v5965_v56 }
 0x292   : > { %v1748_v39 = vpop.f32.mrb[24].mxu1  ;;  %4057 = vmatpush3.bf16.msra.mxu1 %v4323_v4  ;;  %v1710_v31 = vpop.f32.mrb[26].mxu0  ;;  %4028 = vmatprep.mubr.bf16.mxu0 %v5505_v16  ;;  %v4326_v16 = vld [vmem:[#allocation19 + $0x28] sm:$0xff]  }
 0x293   : > { %v1749_v9 = vadd.f32 %v1748_v39, %v5965_v56  ;;  %v3846_v43 = vpop.f32.mrb[25].mxu1  ;;  %v1711_v27 = vadd.f32 %v1710_v31, %v5967_v26  ;;  %v3841_v48 = vpop.f32.mrb[27].mxu0  ;;  %4058 = vmatprep.subr.bf16.mxu1 %v4324_v51 }
 0x294   : > { %v1751_v1 = vpop.f32.mrb[26].mxu1 }
 0x295   : > { %v2517_v6 = vpack.c.bf16 %v1711_v27, %v1708_v32  ;;  %v1752_v59 = vadd.f32 %v1751_v1, %v5967_v26  ;;  %v3847_v30 = vpop.f32.mrb[27].mxu1 }
 0x296   : > { %4059 = vmatpush3.bf16.msra.mxu1 %v4324_v51 }
 0x297   : > { %v2518_v55 = vpack.c.bf16 %v1752_v59, %v1749_v9  ;;  %3996 = vmatprep.mubr.bf16.mxu1 %v2517_v6  ;;  %4060 = vmatprep.subr.bf16.mxu1 %v4325_v53 }
 0x298   : > { %v1789_v2 = vpop.f32.mrb[28].mxu0 }
 0x299   : > { %3997 = vmatmul.mubr.bf16.gmra.mrb[72].mxu1 %v2518_v55  ;;  %4029 = vmatmul.mubr.bf16.gmra.mrb[72].mxu0 %v5514_v28  ;;  %v3852_v41 = vpop.f32.mrb[29].mxu0  ;;  %v1790_v21 = vadd.f32 %v1789_v2, %v5965_v56 }
 0x29a   : > { %v1830_v58 = vpop.f32.mrb[28].mxu1  ;;  %4061 = vmatpush3.bf16.msra.mxu1 %v4325_v53  ;;  %v1792_v62 = vpop.f32.mrb[30].mxu0  ;;  %4032 = vmatprep.mubr.bf16.mxu0 %v5542_v57  ;;  %v4328_v57 = vld [vmem:[#allocation19 + $0x38] sm:$0xff]  }
 0x29b   : > { %v1831_v60 = vadd.f32 %v1830_v58, %v5965_v56  ;;  %v3858_v63 = vpop.f32.mrb[29].mxu1  ;;  %v1793_v37 = vadd.f32 %v1792_v62, %v5967_v26  ;;  %v3853_v42 = vpop.f32.mrb[31].mxu0  ;;  %4062 = vmatprep.subr.bf16.mxu1 %v4326_v16  ;;  %v6011_v56 = vld [vmem:[#allocation14 + $0x8] sm:$0xff] }
 0x29c   : > { %v1833_v11 = vpop.f32.mrb[30].mxu1 }
 0x29d   : > { %v2519_v12 = vpack.c.bf16 %v1793_v37, %v1790_v21  ;;  %v1834_v28 = vadd.f32 %v1833_v11, %v5967_v26  ;;  %v3859_v47 = vpop.f32.mrb[31].mxu1 }
 0x29e   : > { %4063 = vmatpush3.bf16.msra.mxu1 %v4326_v16 }
 0x29f   : > { %v2520_v24 = vpack.c.bf16 %v1834_v28, %v1831_v60  ;;  %4000 = vmatprep.mubr.bf16.mxu1 %v2519_v12  ;;  %4064 = vmatprep.subr.bf16.mxu1 %v4327_v3 }
 0x2a0   : > { %v1883_v13 = vpop.f32.mrb[32].mxu0 }
 0x2a1   : > { %4001 = vmatmul.mubr.bf16.gmra.mrb[76].mxu1 %v2520_v24  ;;  %4033 = vmatmul.mubr.bf16.gmra.mrb[76].mxu0 %v5548_v10  ;;  %v3864_v8 = vpop.f32.mrb[33].mxu0  ;;  %v1884_v26 = vadd.f32 %v1883_v13, %v6009_v15 }
 0x2a2   : > { %v1924_v50 = vpop.f32.mrb[32].mxu1  ;;  %4065 = vmatpush3.bf16.msra.mxu1 %v4327_v3  ;;  %v1886_v61 = vpop.f32.mrb[34].mxu0  ;;  %4036 = vmatprep.mubr.bf16.mxu0 %v5580_v36 }
 0x2a3   : > { %v1925_v7 = vadd.f32 %v1924_v50, %v6009_v15  ;;  %v3870_v29 = vpop.f32.mrb[33].mxu1  ;;  %v1887_v44 = vadd.f32 %v1886_v61, %v6011_v56  ;;  %v3865_v45 = vpop.f32.mrb[35].mxu0  ;;  %4066 = vmatprep.subr.bf16.mxu1 %v4328_v57 }
 0x2a4   : > { %v1927_v17 = vpop.f32.mrb[34].mxu1 }
 0x2a5   : > { %v3003_v5 = vpack.c.bf16 %v1887_v44, %v1884_v26  ;;  %v1928_v33 = vadd.f32 %v1927_v17, %v6011_v56  ;;  %v3871_v10 = vpop.f32.mrb[35].mxu1 }
 0x2a6   : > { %4067 = vmatpush3.bf16.msra.mxu1 %v4328_v57 }
 0x2a7   : > { %v3004_v46 = vpack.c.bf16 %v1928_v33, %v1925_v7  ;;  %4068 = vmatprep.mubr.bf16.mxu1 %v3003_v5 }
 0x2a8   : > { %v1965_v0 = vpop.f32.mrb[36].mxu0 }
 0x2a9   : > { %4037 = vmatmul.mubr.bf16.gmra.mrb[80].mxu0 %v5593_v54  ;;  %4069 = vmatmul.mubr.bf16.vlgmr.msra.gmra.mrb[80].mxu1 %v3004_v46  ;;  %v3876_v36 = vpop.f32.mrb[37].mxu0  ;;  %v1966_v18 = vadd.f32 %v1965_v0, %v6009_v15 }
 0x2aa   : > { %v2006_v4 = vpop.f32.mrb[36].mxu1  ;;  %v1968_v22 = vpop.f32.mrb[38].mxu0  ;;  %4040 = vmatprep.mubr.bf16.mxu0 %v5618_v20 }
 0x2ab   : > { %v2007_v40 = vadd.f32 %v2006_v4, %v6009_v15  ;;  %v3882_v23 = vpop.f32.mrb[37].mxu1  ;;  %v1969_v35 = vadd.f32 %v1968_v22, %v6011_v56  ;;  %v3877_v51 = vpop.f32.mrb[39].mxu0 }
 0x2ac   : > { %v2009_v25 = vpop.f32.mrb[38].mxu1 }
 0x2ad   : > { %v3005_v38 = vpack.c.bf16 %v1969_v35, %v1966_v18  ;;  %v2010_v39 = vadd.f32 %v2009_v25, %v6011_v56  ;;  %v3883_v31 = vpop.f32.mrb[39].mxu1 }
 0x2af   : > { %v3006_v54 = vpack.c.bf16 %v2010_v39, %v2007_v40  ;;  %4072 = vmatprep.mubr.bf16.mxu1 %v3005_v38 }
 0x2b0   : > { %v2047_v32 = vpop.f32.mrb[40].mxu0 }
 0x2b1   : > { %4041 = vmatmul.mubr.bf16.gmra.mrb[84].mxu0 %v5623_v19  ;;  %4073 = vmatmul.mubr.bf16.gmra.mrb[84].mxu1 %v3006_v54  ;;  %v3888_v20 = vpop.f32.mrb[41].mxu0  ;;  %v2048_v27 = vadd.f32 %v2047_v32, %v6009_v15 }
 0x2b2   : > { %v2088_v9 = vpop.f32.mrb[40].mxu1  ;;  %v2050_v43 = vpop.f32.mrb[42].mxu0  ;;  %4044 = vmatprep.mubr.bf16.mxu0 %v5649_v52 }
 0x2b3   : > { %v2089_v48 = vadd.f32 %v2088_v9, %v6009_v15  ;;  %v3894_v53 = vpop.f32.mrb[41].mxu1  ;;  %v2051_v1 = vadd.f32 %v2050_v43, %v6011_v56  ;;  %v3889_v6 = vpop.f32.mrb[43].mxu0 }
 0x2b4   : > { %v2091_v59 = vpop.f32.mrb[42].mxu1 }
 0x2b5   : > { %v3007_v30 = vpack.c.bf16 %v2051_v1, %v2048_v27  ;;  %v2092_v55 = vadd.f32 %v2091_v59, %v6011_v56  ;;  %v3895_v16 = vpop.f32.mrb[43].mxu1 }
 0x2b7   : > { %v3008_v19 = vpack.c.bf16 %v2092_v55, %v2089_v48  ;;  %4076 = vmatprep.mubr.bf16.mxu1 %v3007_v30 }
 0x2b8   : > { %v2129_v2 = vpop.f32.mrb[44].mxu0 }
 0x2b9   : > { %4045 = vmatmul.mubr.bf16.gmra.mrb[88].mxu0 %v5664_v14  ;;  %4077 = vmatmul.mubr.bf16.gmra.mrb[88].mxu1 %v3008_v19  ;;  %v3900_v52 = vpop.f32.mrb[45].mxu0  ;;  %v2130_v62 = vadd.f32 %v2129_v2, %v6009_v15 }
 0x2ba   : > { %v2170_v41 = vpop.f32.mrb[44].mxu1  ;;  %v2132_v58 = vpop.f32.mrb[46].mxu0  ;;  %4048 = vmatprep.mubr.bf16.mxu0 %v5700_v49 }
 0x2bb   : > { %v2171_v21 = vadd.f32 %v2170_v41, %v6009_v15  ;;  %v3906_v60 = vpop.f32.mrb[45].mxu1  ;;  %v2133_v63 = vadd.f32 %v2132_v58, %v6011_v56  ;;  %v3901_v37 = vpop.f32.mrb[47].mxu0 }
 0x2bc   : > { %v2173_v42 = vpop.f32.mrb[46].mxu1 }
 0x2bd   : > { %v3009_v3 = vpack.c.bf16 %v2133_v63, %v2130_v62  ;;  %v2174_v11 = vadd.f32 %v2173_v42, %v6011_v56  ;;  %v3907_v12 = vpop.f32.mrb[47].mxu1 }
 0x2bf   : > { %v3010_v14 = vpack.c.bf16 %v2174_v11, %v2171_v21  ;;  %4080 = vmatprep.mubr.bf16.mxu1 %v3009_v3 }
 0x2c0   : > { %v2211_v28 = vpop.f32.mrb[48].mxu0 }
 0x2c1   : > { %4049 = vmatmul.mubr.bf16.gmra.mrb[92].mxu0 %v5710_v34  ;;  %4081 = vmatmul.mubr.bf16.gmra.mrb[92].mxu1 %v3010_v14  ;;  %v3912_v49 = vpop.f32.mrb[49].mxu0  ;;  %v2212_v57 = vadd.f32 %v2211_v28, %v6009_v15 }
 0x2c2   : > { %v2252_v47 = vpop.f32.mrb[48].mxu1  ;;  %v2214_v24 = vpop.f32.mrb[50].mxu0 }
 0x2c3   : > { %v2253_v13 = vadd.f32 %v2252_v47, %v6009_v15  ;;  %v3918_v8 = vpop.f32.mrb[49].mxu1  ;;  %v2215_v50 = vadd.f32 %v2214_v24, %v6011_v56  ;;  %v3913_v61 = vpop.f32.mrb[51].mxu0 }
 0x2c4   : > { %v2255_v26 = vpop.f32.mrb[50].mxu1 }
 0x2c5   : > { %v3011_v7 = vpack.c.bf16 %v2215_v50, %v2212_v57  ;;  %v2256_v29 = vadd.f32 %v2255_v26, %v6011_v56  ;;  %v3919_v44 = vpop.f32.mrb[51].mxu1 }
 0x2c7   : > { %v3012_v45 = vpack.c.bf16 %v2256_v29, %v2253_v13  ;;  %4084 = vmatprep.mubr.bf16.mxu1 %v3011_v7 }
 0x2c8   : > { %v2293_v34 = vpop.f32.mrb[52].mxu0 }
 0x2c9   : > { %4085 = vmatmul.mubr.bf16.gmra.mrb[96].mxu1 %v3012_v45  ;;  %v3924_v17 = vpop.f32.mrb[53].mxu0  ;;  %v2294_v10 = vadd.f32 %v2293_v34, %v6009_v15 }
 0x2ca   : > { %v2334_v5 = vpop.f32.mrb[52].mxu1  ;;  %v2296_v33 = vpop.f32.mrb[54].mxu0 }
 0x2cb   : > { %v2335_v46 = vadd.f32 %v2334_v5, %v6009_v15  ;;  %v3930_v0 = vpop.f32.mrb[53].mxu1  ;;  %v2297_v36 = vadd.f32 %v2296_v33, %v6011_v56  ;;  %v3925_v4 = vpop.f32.mrb[55].mxu0 }
 0x2cc   : > { %v2337_v22 = vpop.f32.mrb[54].mxu1 }
 0x2cd   : > { %v3013_v18 = vpack.c.bf16 %v2297_v36, %v2294_v10  ;;  %v2338_v40 = vadd.f32 %v2337_v22, %v6011_v56  ;;  %v3931_v23 = vpop.f32.mrb[55].mxu1 }
 0x2cf   : > { %v3014_v35 = vpack.c.bf16 %v2338_v40, %v2335_v46  ;;  %4088 = vmatprep.mubr.bf16.mxu1 %v3013_v18 }
 0x2d0   : > { %v2375_v51 = vpop.f32.mrb[56].mxu0 }
 0x2d1   : > { %4089 = vmatmul.mubr.bf16.gmra.mrb[100].mxu1 %v3014_v35  ;;  %v3936_v25 = vpop.f32.mrb[57].mxu0  ;;  %v2376_v31 = vadd.f32 %v2375_v51, %v6009_v15 }
 0x2d2   : > { %v2416_v38 = vpop.f32.mrb[56].mxu1  ;;  %v2378_v39 = vpop.f32.mrb[58].mxu0 }
 0x2d3   : > { %v2417_v54 = vadd.f32 %v2416_v38, %v6009_v15  ;;  %v3942_v32 = vpop.f32.mrb[57].mxu1  ;;  %v2379_v20 = vadd.f32 %v2378_v39, %v6011_v56  ;;  %v3937_v9 = vpop.f32.mrb[59].mxu0 }
 0x2d4   : > { %v2419_v43 = vpop.f32.mrb[58].mxu1 }
 0x2d5   : > { %v3015_v27 = vpack.c.bf16 %v2379_v20, %v2376_v31  ;;  %v2420_v48 = vadd.f32 %v2419_v43, %v6011_v56  ;;  %v3943_v53 = vpop.f32.mrb[59].mxu1 }
 0x2d7   : > { %v3016_v1 = vpack.c.bf16 %v2420_v48, %v2417_v54  ;;  %4092 = vmatprep.mubr.bf16.mxu1 %v3015_v27 }
 0x2d8   : > { %v2457_v6 = vpop.f32.mrb[60].mxu0 }
 0x2d9   : > { %4093 = vmatmul.mubr.bf16.gmra.mrb[104].mxu1 %v3016_v1  ;;  %v3948_v59 = vpop.f32.mrb[61].mxu0  ;;  %v2458_v16 = vadd.f32 %v2457_v6, %v6009_v15 }
 0x2da   : > { %v2498_v30 = vpop.f32.mrb[60].mxu1  ;;  %v2460_v55 = vpop.f32.mrb[62].mxu0 }
 0x2db   : > { %v2499_v19 = vadd.f32 %v2498_v30, %v6009_v15  ;;  %v3954_v2 = vpop.f32.mrb[61].mxu1  ;;  %v2461_v52 = vadd.f32 %v2460_v55, %v6011_v56  ;;  %v3949_v41 = vpop.f32.mrb[63].mxu0 }
 0x2dc   : > { %v2501_v58 = vpop.f32.mrb[62].mxu1 }
 0x2dd   : > { %v3017_v62 = vpack.c.bf16 %v2461_v52, %v2458_v16  ;;  %v2502_v21 = vadd.f32 %v2501_v58, %v6011_v56  ;;  %v3955_v60 = vpop.f32.mrb[63].mxu1 }
 0x2df   : > { %v3018_v63 = vpack.c.bf16 %v2502_v21, %v2499_v19  ;;  %4096 = vmatprep.mubr.bf16.mxu1 %v3017_v62 }
 0x2e1   : > { %4097 = vmatmul.mubr.bf16.gmra.mrb[108].mxu1 %v3018_v63 }
 0x35c   : > { %v3990_v37 = vpop.f32.mrb[64].mxu1  ;;  %v4022_v42 = vpop.f32.mrb[64].mxu0 }
 0x35d   : > { %2973 = vst [vmem:[%s6055_s26 + $0x10] sm:$0xff] %v4022_v42  ;;  %v2699_v15 = vpop.f32.mrb[65].mxu1  ;;  %v2844_v3 = vpop.f32.mrb[65].mxu0 }
 0x35e   : > { %2971 = vst [vmem:[%s6055_s26] sm:$0xff] %v2844_v3  ;;  %v3991_v56 = vpop.f32.mrb[66].mxu1  ;;  %v4023_v11 = vpop.f32.mrb[66].mxu0 }
 0x35f   : > { %2974 = vst [vmem:[%s6055_s26 + $0x18] sm:$0xff] %v4023_v11  ;;  %v2702_v12 = vpop.f32.mrb[67].mxu1  ;;  %v2847_v14 = vpop.f32.mrb[67].mxu0 }
 0x360   : > { %2972 = vst [vmem:[%s6055_s26 + $0x8] sm:$0xff] %v2847_v14 }
 0x364   : > { %v3994_v28 = vpop.f32.mrb[68].mxu1  ;;  %v4026_v49 = vpop.f32.mrb[68].mxu0 }
 0x365   : > { %2977 = vst [vmem:[%s6055_s26 + $0x30] sm:$0xff] %v4026_v49  ;;  %v2715_v47 = vpop.f32.mrb[69].mxu1  ;;  %v2860_v24 = vpop.f32.mrb[69].mxu0 }
 0x366   : > { %2975 = vst [vmem:[%s6055_s26 + $0x20] sm:$0xff] %v2860_v24  ;;  %v3995_v57 = vpop.f32.mrb[70].mxu1  ;;  %v4027_v13 = vpop.f32.mrb[70].mxu0 }
 0x367   : > { %2978 = vst [vmem:[%s6055_s26 + $0x38] sm:$0xff] %v4027_v13  ;;  %v6064_v8 = vpop.f32.mrb[71].mxu1  ;;  %v2863_v50 = vpop.f32.mrb[71].mxu0 }
 0x368   : > { %2976 = vst [vmem:[%s6055_s26 + $0x28] sm:$0xff] %v2863_v50 }
 0x36c   : > { %v6067_v61 = vpop.f32.mrb[72].mxu1  ;;  %v4030_v26 = vpop.f32.mrb[72].mxu0 }
 0x36d   : > { %2981 = vst [vmem:[%s6055_s26 + $0x50] sm:$0xff] %v4030_v26  ;;  %v6070_v7 = vpop.f32.mrb[73].mxu1  ;;  %v2876_v29 = vpop.f32.mrb[73].mxu0 }
 0x36e   : > { %2979 = vst [vmem:[%s6055_s26 + $0x40] sm:$0xff] %v2876_v29  ;;  %v6073_v44 = vpop.f32.mrb[74].mxu1  ;;  %v4031_v45 = vpop.f32.mrb[74].mxu0 }
 0x36f   : > { %2982 = vst [vmem:[%s6055_s26 + $0x58] sm:$0xff] %v4031_v45  ;;  %v6076_v34 = vpop.f32.mrb[75].mxu1  ;;  %v2879_v17 = vpop.f32.mrb[75].mxu0 }
 0x370   : > { %2980 = vst [vmem:[%s6055_s26 + $0x48] sm:$0xff] %v2879_v17 }
 0x374   : > { %v6079_v5 = vpop.f32.mrb[76].mxu1  ;;  %v4034_v33 = vpop.f32.mrb[76].mxu0 }
 0x375   : > { %2985 = vst [vmem:[%s6055_s26 + $0x70] sm:$0xff] %v4034_v33  ;;  %v6082_v10 = vpop.f32.mrb[77].mxu1  ;;  %v2892_v46 = vpop.f32.mrb[77].mxu0 }
 0x376   : > { %2983 = vst [vmem:[%s6055_s26 + $0x60] sm:$0xff] %v2892_v46  ;;  %v6085_v0 = vpop.f32.mrb[78].mxu1  ;;  %v4035_v36 = vpop.f32.mrb[78].mxu0 }
 0x377   : > { %2986 = vst [vmem:[%s6055_s26 + $0x78] sm:$0xff] %v4035_v36  ;;  %v6088_v4 = vpop.f32.mrb[79].mxu1  ;;  %v2895_v22 = vpop.f32.mrb[79].mxu0 }
 0x378   : > { %2984 = vst [vmem:[%s6055_s26 + $0x68] sm:$0xff] %v2895_v22 }
 0x37c   : > { %v4038_v18 = vpop.f32.mrb[80].mxu0  ;;  %v4070_v40 = vpop.f32.mrb[80].mxu1 }
 0x37d   : > { %v2917_v23 = vadd.f32 %v4038_v18, %v3990_v37  ;;  %3246 = vst [vmem:[%s6092_s8 + $0x10] sm:$0xff] %v4070_v40  ;;  %v2908_v35 = vpop.f32.mrb[81].mxu0  ;;  %v3117_v51 = vpop.f32.mrb[81].mxu1 }
 0x37e   : > { %v2909_v25 = vadd.f32 %v2908_v35, %v2699_v15  ;;  %3244 = vst [vmem:[%s6092_s8] sm:$0xff] %v3117_v51  ;;  %v4039_v38 = vpop.f32.mrb[82].mxu0  ;;  %v4071_v39 = vpop.f32.mrb[82].mxu1 }
 0x37f   : > { %2989 = vst [vmem:[%s6055_s26 + $0x90] sm:$0xff] %v2917_v23  ;;  %v2920_v31 = vadd.f32 %v4039_v38, %v3991_v56  ;;  %3247 = vst [vmem:[%s6092_s8 + $0x18] sm:$0xff] %v4071_v39  ;;  %v2911_v54 = vpop.f32.mrb[83].mxu0  ;;  %v3120_v32 = vpop.f32.mrb[83].mxu1 }
 0x380   : > { %2987 = vst [vmem:[%s6055_s26 + $0x80] sm:$0xff] %v2909_v25  ;;  %v2912_v20 = vadd.f32 %v2911_v54, %v2702_v12  ;;  %3245 = vst [vmem:[%s6092_s8 + $0x8] sm:$0xff] %v3120_v32 }
 0x381   : > { %2990 = vst [vmem:[%s6055_s26 + $0x98] sm:$0xff] %v2920_v31 }
 0x382   : > { %2988 = vst [vmem:[%s6055_s26 + $0x88] sm:$0xff] %v2912_v20 }
 0x384   : > { %v4042_v9 = vpop.f32.mrb[84].mxu0  ;;  %v4074_v43 = vpop.f32.mrb[84].mxu1 }
 0x385   : > { %v2933_v27 = vadd.f32 %v4042_v9, %v3994_v28  ;;  %3250 = vst [vmem:[%s6092_s8 + $0x30] sm:$0xff] %v4074_v43  ;;  %v2924_v48 = vpop.f32.mrb[85].mxu0  ;;  %v3133_v53 = vpop.f32.mrb[85].mxu1 }
 0x386   : > { %v2925_v1 = vadd.f32 %v2924_v48, %v2715_v47  ;;  %3248 = vst [vmem:[%s6092_s8 + $0x20] sm:$0xff] %v3133_v53  ;;  %v4043_v6 = vpop.f32.mrb[86].mxu0  ;;  %v4075_v59 = vpop.f32.mrb[86].mxu1 }
 0x387   : > { %2993 = vst [vmem:[%s6055_s26 + $0xb0] sm:$0xff] %v2933_v27  ;;  %v2936_v30 = vadd.f32 %v4043_v6, %v3995_v57  ;;  %3251 = vst [vmem:[%s6092_s8 + $0x38] sm:$0xff] %v4075_v59  ;;  %v2927_v55 = vpop.f32.mrb[87].mxu0  ;;  %v3136_v16 = vpop.f32.mrb[87].mxu1 }
 0x388   : > { %2991 = vst [vmem:[%s6055_s26 + $0xa0] sm:$0xff] %v2925_v1  ;;  %v2928_v19 = vadd.f32 %v2927_v55, %v6064_v8  ;;  %3249 = vst [vmem:[%s6092_s8 + $0x28] sm:$0xff] %v3136_v16 }
 0x389   : > { %2994 = vst [vmem:[%s6055_s26 + $0xb8] sm:$0xff] %v2936_v30 }
 0x38a   : > { %2992 = vst [vmem:[%s6055_s26 + $0xa8] sm:$0xff] %v2928_v19 }
 0x38c   : > { %v4046_v2 = vpop.f32.mrb[88].mxu0  ;;  %v4078_v52 = vpop.f32.mrb[88].mxu1 }
 0x38d   : > { %v2949_v41 = vadd.f32 %v4046_v2, %v6067_v61  ;;  %3254 = vst [vmem:[%s6092_s8 + $0x50] sm:$0xff] %v4078_v52  ;;  %v2940_v58 = vpop.f32.mrb[89].mxu0  ;;  %v3149_v62 = vpop.f32.mrb[89].mxu1 }
 0x38e   : > { %v2941_v21 = vadd.f32 %v2940_v58, %v6070_v7  ;;  %3252 = vst [vmem:[%s6092_s8 + $0x40] sm:$0xff] %v3149_v62  ;;  %v4047_v60 = vpop.f32.mrb[90].mxu0  ;;  %v4079_v63 = vpop.f32.mrb[90].mxu1 }
 0x38f   : > { %2997 = vst [vmem:[%s6055_s26 + $0xd0] sm:$0xff] %v2949_v41  ;;  %v2952_v37 = vadd.f32 %v4047_v60, %v6073_v44  ;;  %3255 = vst [vmem:[%s6092_s8 + $0x58] sm:$0xff] %v4079_v63  ;;  %v2943_v42 = vpop.f32.mrb[91].mxu0  ;;  %v3152_v15 = vpop.f32.mrb[91].mxu1 }
 0x390   : > { %2995 = vst [vmem:[%s6055_s26 + $0xc0] sm:$0xff] %v2941_v21  ;;  %v2944_v3 = vadd.f32 %v2943_v42, %v6076_v34  ;;  %3253 = vst [vmem:[%s6092_s8 + $0x48] sm:$0xff] %v3152_v15 }
 0x391   : > { %2998 = vst [vmem:[%s6055_s26 + $0xd8] sm:$0xff] %v2952_v37 }
 0x392   : > { %2996 = vst [vmem:[%s6055_s26 + $0xc8] sm:$0xff] %v2944_v3 }
 0x394   : > { %v4050_v56 = vpop.f32.mrb[92].mxu0  ;;  %v4082_v11 = vpop.f32.mrb[92].mxu1 }
 0x395   : > { %v2965_v12 = vadd.f32 %v4050_v56, %v6079_v5  ;;  %3258 = vst [vmem:[%s6092_s8 + $0x70] sm:$0xff] %v4082_v11  ;;  %v2956_v14 = vpop.f32.mrb[93].mxu0  ;;  %v3165_v28 = vpop.f32.mrb[93].mxu1 }
 0x396   : > { %v2957_v49 = vadd.f32 %v2956_v14, %v6082_v10  ;;  %3256 = vst [vmem:[%s6092_s8 + $0x60] sm:$0xff] %v3165_v28  ;;  %v4051_v47 = vpop.f32.mrb[94].mxu0  ;;  %v4083_v24 = vpop.f32.mrb[94].mxu1 }
 0x397   : > { %3001 = vst [vmem:[%s6055_s26 + $0xf0] sm:$0xff] %v2965_v12  ;;  %v2968_v57 = vadd.f32 %v4051_v47, %v6085_v0  ;;  %3259 = vst [vmem:[%s6092_s8 + $0x78] sm:$0xff] %v4083_v24  ;;  %v2959_v13 = vpop.f32.mrb[95].mxu0  ;;  %v3168_v8 = vpop.f32.mrb[95].mxu1 }
 0x398   : > { %2999 = vst [vmem:[%s6055_s26 + $0xe0] sm:$0xff] %v2957_v49  ;;  %v2960_v50 = vadd.f32 %v2959_v13, %v6088_v4  ;;  %3257 = vst [vmem:[%s6092_s8 + $0x68] sm:$0xff] %v3168_v8 }
 0x399   : > { %3002 = vst [vmem:[%s6055_s26 + $0xf8] sm:$0xff] %v2968_v57 }
 0x39a   : > { %3000 = vst [vmem:[%s6055_s26 + $0xe8] sm:$0xff] %v2960_v50 }
 0x39b   : > { %4784 = shalt.err (!%p4781_p1)
}
 0x39c   : > { %s4785_s13 = scalar_lea.hbm %s6137_s30, 4096  ;;  %s4789_s29 = scalar_lea.hbm %s6314_s7, 8192 }
 0x39d   : > { %p4786_p13 = scmp.ne.s32.totalorder %s6137_s30, %s4785_s13  ;;  %p4790_p2 = scmp.lt.u32.totalorder %s6137_s30, %s6314_s7 }
 0x39e   : > { %p4791_p6 = scmp.lt.u32.totalorder %s4789_s29, %s4785_s13  ;;  %p4793_p5 = scmp.lt.u32.totalorder %s4785_s13, %s6137_s30 }
 0x39f   : > { %p4787_p0 = pnand %p4786_p13, %p6315_p9 }
 0x3a0   : > { %p4792_p11 = por %p4791_p6, %p4790_p2 }
 0x3a1   : > { %p4788_p7 = pneg %p4787_p0 }
 0x3a2   : > { %p4794_p10 = por %p4793_p5, %p4792_p11 }
 0x3a4   : > { %p4795_p8 = pnand %p4794_p10, %p4788_p7 }
 0x3a6   : > { %4798 = shalt.err (!%p4795_p8)
}
 0x3a7   : > { %s4913_s5 = smov 128   ;;  %s4914_s15 = smov 8   ;;  %v4086_v61 = vpop.f32.mrb[96].mxu1 }
 0x3a8   : > { %4188 = dma.vmem_to_hbm [thread:$0]  (%p6315_p9), %s6139_s14, 4096, %s6137_s30, %s3277_s20, %s4913_s5, %s4913_s5, %s4914_s15   ;;  %v3181_v26 = vpop.f32.mrb[97].mxu1 }
 0x3a9   : > { %3262 = vst [vmem:[%s6092_s8 + $0x90] sm:$0xff] %v4086_v61  ;;  %3260 = vst [vmem:[%s6092_s8 + $0x80] sm:$0xff] %v3181_v26  ;;  %v4087_v7 = vpop.f32.mrb[98].mxu1  ;;  %s3311_s14 = sshll.u32 %s6092_s8, 4  ;;  %s6316_s11 = sld [smem:[#allocation43_spill]]  ;;  %s6195_s14 = int_to_ptr.vmem [resolvable:$true] %s3311_s14 }
 0x3aa   : > { %3263 = vst [vmem:[%s6092_s8 + $0x98] sm:$0xff] %v4087_v7  ;;  %v3184_v29 = vpop.f32.mrb[99].mxu1  ;;  %s3282_s16 = scalar_lea.sflag [#allocation22], %s5351_s6  ;;  %s4799_s1 = scalar_lea.vmem %s6195_s14, 4096 }
 0x3ab   : > { %3261 = vst [vmem:[%s6092_s8 + $0x88] sm:$0xff] %v3184_v29  ;;  %v4090_v44 = vpop.f32.mrb[100].mxu1  ;;  %p4800_p12 = scmp.ne.s32.totalorder %s6195_s14, %s4799_s1  ;;  %s4915_s27 = smov [#allocation21]  }
 0x3ac   : > { %3266 = vst [vmem:[%s6092_s8 + $0xb0] sm:$0xff] %v4090_v44  ;;  %v3197_v45 = vpop.f32.mrb[101].mxu1  ;;  %s4803_s13 = sshll.u32 %s4915_s27, 4  ;;  %s4804_s13 = int_to_ptr.vmem [resolvable:$false] %s4803_s13 }
 0x3ad   : > { %3264 = vst [vmem:[%s6092_s8 + $0xa0] sm:$0xff] %v3197_v45  ;;  %v4091_v34 = vpop.f32.mrb[102].mxu1  ;;  %p4801_p3 = pnand %p4800_p12, %p6315_p9  ;;  %s4805_s28 = scalar_lea.vmem %s4804_s13, 8192 }
 0x3ae   : > { %3267 = vst [vmem:[%s6092_s8 + $0xb8] sm:$0xff] %v4091_v34  ;;  %v3200_v17 = vpop.f32.mrb[103].mxu1  ;;  %p4806_p1 = scmp.lt.s32.totalorder %s6195_s14, %s4804_s13  ;;  %p4807_p13 = scmp.lt.s32.totalorder %s4805_s28, %s4799_s1 }
 0x3af   : > { %3265 = vst [vmem:[%s6092_s8 + $0xa8] sm:$0xff] %v3200_v17  ;;  %v4094_v5 = vpop.f32.mrb[104].mxu1  ;;  %s6193_s0 = scalar_lea.hbm %s6316_s11, %s3626_s19  ;;  %p4802_p4 = pneg %p4801_p3 }
 0x3b0   : > { %3270 = vst [vmem:[%s6092_s8 + $0xd0] sm:$0xff] %v4094_v5  ;;  %v3213_v33 = vpop.f32.mrb[105].mxu1  ;;  %p4808_p0 = por %p4807_p13, %p4806_p1 }
 0x3b1   : > { %3268 = vst [vmem:[%s6092_s8 + $0xc0] sm:$0xff] %v3213_v33  ;;  %v4095_v10 = vpop.f32.mrb[106].mxu1 }
 0x3b2   : > { %3271 = vst [vmem:[%s6092_s8 + $0xd8] sm:$0xff] %v4095_v10  ;;  %v3216_v46 = vpop.f32.mrb[107].mxu1  ;;  %p4809_p7 = pnand %p4808_p0, %p4802_p4 }
 0x3b3   : > { %3269 = vst [vmem:[%s6092_s8 + $0xc8] sm:$0xff] %v3216_v46 }
 0x3b4   : > { %v4098_v0 = vpop.f32.mrb[108].mxu1 }
 0x3b5   : > { %3274 = vst [vmem:[%s6092_s8 + $0xf0] sm:$0xff] %v4098_v0  ;;  %v3229_v36 = vpop.f32.mrb[109].mxu1 }
 0x3b6   : > { %3272 = vst [vmem:[%s6092_s8 + $0xe0] sm:$0xff] %v3229_v36  ;;  %v4099_v4 = vpop.f32.mrb[110].mxu1 }
 0x3b7   : > { %3275 = vst [vmem:[%s6092_s8 + $0xf8] sm:$0xff] %v4099_v4  ;;  %v3232_v22 = vpop.f32.mrb[111].mxu1 }
 0x3b8   : > { %3273 = vst [vmem:[%s6092_s8 + $0xe8] sm:$0xff] %v3232_v22 }
 0x3b9   : > { %4812 = shalt.err (!%p4809_p7)
}
 0x3ba   : > { %s4813_s8 = scalar_lea.hbm %s6193_s0, 4096  ;;  %s4817_s29 = scalar_lea.hbm %s6316_s11, 8192 }
 0x3bb   : > { %p4814_p2 = scmp.ne.s32.totalorder %s6193_s0, %s4813_s8  ;;  %p4818_p5 = scmp.lt.u32.totalorder %s6193_s0, %s6316_s11 }
 0x3bc   : > { %p4819_p10 = scmp.lt.u32.totalorder %s4817_s29, %s4813_s8  ;;  %p4821_p12 = scmp.lt.u32.totalorder %s4813_s8, %s6193_s0 }
 0x3bd   : > { %p4815_p6 = pnand %p4814_p2, %p6315_p9 }
 0x3be   : > { %p4820_p8 = por %p4819_p10, %p4818_p5 }
 0x3bf   : > { %p4816_p11 = pneg %p4815_p6 }
 0x3c0   : > { %p4822_p3 = por %p4821_p12, %p4820_p8 }
 0x3c2   : > { %p4823_p4 = pnand %p4822_p3, %p4816_p11 }
 0x3c4   : > { %4826 = shalt.err (!%p4823_p4)
}
 0x3c5   : > { %4189 = dma.vmem_to_hbm [thread:$0]  (%p6315_p9), %s6195_s14, 4096, %s6193_s0, %s3282_s16, %s4913_s5, %s4913_s5, %s4914_s15  }
 0x3c6 PF: > { %s3326_s30 = sand.u32 1, %s4881_s21   ;;  %p6317_p1 = scmp.ne.s32.totalorder %s6297_s2, 0 }
 0x3c7   : > { %p6318_p13 = scmp.ge.s32.totalorder %s4893_s24, 2  ;;  %s3327_s20 = scalar_lea.sflag [#allocation4], %s3326_s30 }
 0x3c9   : > { %p4228_p0 = pnand %p6318_p13, %p6317_p1 }
 0x3cb   : > { %4872 = dma.done.wait (!%p4228_p0), %s3327_s20, 4096  }
 0x3cc   : > { %4874 = vsyncadd (!%p4228_p0), %s3327_s20, 4294963200  ;;  %s3336_s12 = scalar_lea.sflag [#allocation22], %s3326_s30 }
 0x3cd   : > { %4876 = dma.done.wait (!%p4228_p0), %s3336_s12, 4096  }
 0x3ce   : > { %4878 = vsyncadd (!%p4228_p0), %s3336_s12, 4294963200  ;;  %p36_p9 = scmp.ge.s32.totalorder %s5234_s25, 4   ;;  %s6319_s21 = smov %s4885_s22 }
 0x3cf   : > { %s6320_s22 = smov %s4889_s23  ;;  %s6321_s23 = smov %s5246_s17 }
 0x3d0   : > { %s6322_s24 = smov %s5234_s25  ;;  %38 = sbr.rel (!%p36_p9) target bundleno = 25 (0x19), region = 175 }
 0x3d7   :  { %3341 = vsyncpa [#allocation3], 1 }
 0x3d8   :  { %3343 = vsyncpa [#allocation3 + $0x1], 1 }
 0x3d9   :  { %3344 = vsyncpa [#allocation6], 1 }
 0x3da   :  { %3346 = vsyncpa [#allocation6 + $0x1], 1 }
 0x3db   :  { %3347 = vsyncpa [#allocation9], 1 }
 0x3dc   :  { %3348 = vsyncpa [#allocation12], 1 }
 0x3dd   :  { %3349 = vsyncpa [#allocation15], 1 }
 0x3de   :  { %3350 = vsyncpa [#allocation18], 1 }
 0x3df   :  { %3351 = vsyncpa [#allocation4], 1 }
 0x3e0   :  { %3353 = vsyncpa [#allocation4 + $0x1], 1 }
 0x3e1   :  { %3354 = vsyncpa [#allocation22], 1 }
 0x3e2   :  { %3356 = vsyncpa [#allocation22 + $0x1], 1 }

</bundles_post_ra>
